<compile_context>
chip_gen: v6e
topology: v6e:2x2x1
jax: 0.10.0
libtpu: 0.0.40
codegen_flags: <defaults>
</compile_context>

<pallas_src>
import jax
import jax.numpy as jnp
from jax import lax
from jax.experimental import pallas as pl
from jax.experimental.pallas import tpu as pltpu


def _round_up(a, b):
    return ((a + b - 1) // b) * b


def _choose_batch_tile(N):
    """Pick the per-grid-step batch tile.

    Prefer large tiles (amortize ~0.35us per-step overhead, fill the MXU M
    dimension); for medium N cap the tile near N/2 so the 'parallel' grid has
    >= 2 steps and both v7x TensorCores are used.  Always a multiple of 8.
    """
    if N >= 1024:
        return 512
    if N >= 16:
        return min(512, _round_up(pl.cdiv(N, 2), 8))
    return _round_up(max(N, 1), 8)


# -----------------------------------------------------------------------------
# Fused kernel: conv(3x3,'same') [as MXU matmul] + ReLU + Linear1 + ReLU +
# Linear2 + Sigmoid for a tile of TB samples per grid step.
# -----------------------------------------------------------------------------
def _fused_kernel(x_ref,      # (TB, C*H*W)   activation tile, lane-dense
                  wconv_ref,  # (C*H*W, O*H*W) conv-as-matmul weight (resident)
                  bconv_ref,  # (1, O*H*W)    conv bias, broadcast row
                  w1t_ref,    # (O*H*W, HID)  linear1 weight, transposed (resident)
                  b1_ref,     # (1, HID)
                  w2_ref,     # (1, HID)      linear2 weight (torch layout)
                  b2_ref,     # (1, 1)
                  out_ref):   # (1, 1, TB)    lane-dense probability row
    x = x_ref[...]                                            # (TB, CHW) f32

    # Conv2d(3x3,'same') + bias + ReLU as one MXU matmul.  Wconv's zeros encode
    # the zero-padding boundary; column order is o-major == torch flatten.
    conv = jnp.dot(x, wconv_ref[...], preferred_element_type=jnp.float32)
    conv = jnp.maximum(conv + bconv_ref[...], 0.0)            # (TB, O*HW)

    # Linear1 + ReLU: one batched MXU matmul (TB, O*HW) @ (O*HW, HID).
    hid = jnp.dot(conv, w1t_ref[...],
                  preferred_element_type=jnp.float32) + b1_ref[...]
    hid = jnp.maximum(hid, 0.0)                               # (TB, HID)

    # Linear2 producing a lane-dense (1, TB) row: w2 (1,HID) x hid (TB,HID).
    logit = lax.dot_general(w2_ref[...], hid,
                            dimension_numbers=(((1,), (1,)), ((), ())),
                            preferred_element_type=jnp.float32)
    logit = logit + b2_ref[...]                               # (1, TB)

    # Numerically stable sigmoid.
    z = jnp.exp(-jnp.abs(logit))
    p = 1.0 / (1.0 + z)
    prob = jnp.where(logit >= 0, p, z * p)
    out_ref[...] = prob.reshape(out_ref.shape)


# -----------------------------------------------------------------------------
# Wrapper: weight preprocessing (pure data movement / one-time work) in JAX,
# the whole per-sample hot path in a single pallas_call.
# -----------------------------------------------------------------------------
def discriminator_forward(x, conv_w, conv_b, w1, b1, w2, b2):
    """x: (N, C, H, W) float32 (NCHW).  Returns (N, 1) probabilities."""
    N, C, H, W = x.shape
    O, Ci, KH, KW = conv_w.shape
    assert Ci == C and (KH, KW) == (3, 3), "kernel assumes 3x3 'same' conv"
    HW = H * W
    CHW = C * HW
    OHW = O * HW
    HID = w1.shape[0]
    assert w1.shape[1] == OHW

    TB = _choose_batch_tile(N)
    N_pad = _round_up(N, TB)
    G = N_pad // TB

    # Lane-dense input layout: one fully-flattened row per sample.
    x_flat = x.reshape(N, CHW).astype(jnp.float32)
    if N_pad != N:
        x_flat = jnp.pad(x_flat, ((0, N_pad - N), (0, 0)))

    # Conv-as-matmul weight: convolve the identity basis once.  Row k of wconv
    # is the flattened conv response to basis image e_k, so by linearity
    # x_flat @ wconv == flatten(conv(x)) exactly (zeros encode 'same' padding).
    # In a real deployment this is precomputed once per set of weights.
    basis = jnp.eye(CHW, dtype=jnp.float32).reshape(CHW, C, H, W)
    wconv = lax.conv_general_dilated(
        basis, conv_w.astype(jnp.float32), window_strides=(1, 1),
        padding="SAME", dimension_numbers=("NCHW", "OIHW", "NCHW"),
        precision=lax.Precision.HIGHEST).reshape(CHW, OHW)

    # Conv bias folded into a single (1, O*HW) broadcast row (o-major order).
    bconv_row = jnp.repeat(conv_b.astype(jnp.float32), HW).reshape(1, OHW)

    w1t = jnp.transpose(w1).astype(jnp.float32)               # (O*HW, HID)
    b1r = b1.reshape(1, HID).astype(jnp.float32)
    w2r = w2.reshape(1, HID).astype(jnp.float32)
    b2r = b2.reshape(1, 1).astype(jnp.float32)

    out = pl.pallas_call(
        _fused_kernel,
        out_shape=jax.ShapeDtypeStruct((G, 1, TB), jnp.float32),
        grid=(G,),
        in_specs=[
            pl.BlockSpec((TB, CHW), lambda g: (g, 0)),        # activation tile
            pl.BlockSpec((CHW, OHW), lambda g: (0, 0)),       # conv-as-matmul W
            pl.BlockSpec((1, OHW), lambda g: (0, 0)),         # conv bias row
            pl.BlockSpec((OHW, HID), lambda g: (0, 0)),       # linear1 W^T
            pl.BlockSpec((1, HID), lambda g: (0, 0)),         # b1
            pl.BlockSpec((1, HID), lambda g: (0, 0)),         # w2
            pl.BlockSpec((1, 1), lambda g: (0, 0)),           # b2
        ],
        out_specs=pl.BlockSpec((1, 1, TB), lambda g: (g, 0, 0)),
        compiler_params=pltpu.CompilerParams(
            dimension_semantics=("parallel",)),
    )(x_flat, wconv, bconv_row, w1t, b1r, w2r, b2r)

    return out.reshape(N_pad)[:N].reshape(N, 1)


# -----------------------------------------------------------------------------
# Pure-JAX reference (mirrors the PyTorch forward) for a correctness check.
# -----------------------------------------------------------------------------
def discriminator_reference(x, conv_w, conv_b, w1, b1, w2, b2):
    N = x.shape[0]
    conv = lax.conv_general_dilated(
        x, conv_w, window_strides=(1, 1), padding="SAME",
        dimension_numbers=("NCHW", "OIHW", "NCHW"),
        precision=lax.Precision.HIGHEST)
    conv = conv + conv_b.reshape(1, -1, 1, 1)
    conv = jnp.maximum(conv, 0.0)
    flat = conv.reshape(N, -1)                                # torch flatten
    hid = jnp.maximum(
        jnp.dot(flat, w1.T, precision=lax.Precision.HIGHEST) + b1, 0.0)
    logit = jnp.dot(hid, w2.T, precision=lax.Precision.HIGHEST) + b2
    return jax.nn.sigmoid(logit)


if __name__ == "__main__":
    # Small shapes consistent with the module: input_dims = (N, C, H, W)
    N, C, H, W = 2, 4, 16, 16
    O, K, HID = 2, 3, 256
    FLAT = H * W * O

    key = jax.random.PRNGKey(0)
    k = jax.random.split(key, 8)

    x = jax.random.normal(k[0], (N, C, H, W), dtype=jnp.float32)

    # Deterministic parameter init (uniform, torch-like fan-in scaling).
    a_conv = 1.0 / jnp.sqrt(C * K * K)
    conv_w = jax.random.uniform(k[1], (O, C, K, K), jnp.float32, -a_conv, a_conv)
    conv_b = jax.random.uniform(k[2], (O,), jnp.float32, -a_conv, a_conv)

    a1 = 1.0 / jnp.sqrt(FLAT)
    w1 = jax.random.uniform(k[3], (HID, FLAT), jnp.float32, -a1, a1)
    b1 = jax.random.uniform(k[4], (HID,), jnp.float32, -a1, a1)

    a2 = 1.0 / jnp.sqrt(HID)
    w2 = jax.random.uniform(k[5], (1, HID), jnp.float32, -a2, a2)
    b2 = jax.random.uniform(k[6], (1,), jnp.float32, -a2, a2)

    out = discriminator_forward(x, conv_w, conv_b, w1, b1, w2, b2)
    out = jax.block_until_ready(out)

    ref = discriminator_reference(x, conv_w, conv_b, w1, b1, w2, b2)
    ref = jax.block_until_ready(ref)

    assert out.shape == (N, 1), out.shape
    assert jnp.allclose(out, ref, atol=1e-4, rtol=1e-4), (out, ref)

    print("KERNEL_OK")
</pallas_src>

<mosaic_0001>
module attributes {stable_mosaic.version = 11 : i64} {
  func.func @_fused_kernel(%arg0: i32, %arg1: memref<8x1024xf32, #tpu.memory_space<vmem>>, %arg2: memref<1024x512xf32, #tpu.memory_space<vmem>>, %arg3: memref<1x512xf32, #tpu.memory_space<vmem>>, %arg4: memref<512x256xf32, #tpu.memory_space<vmem>>, %arg5: memref<1x256xf32, #tpu.memory_space<vmem>>, %arg6: memref<1x256xf32, #tpu.memory_space<vmem>>, %arg7: memref<1x1xf32, #tpu.memory_space<vmem>>, %arg8: memref<1x1x8xf32, #tpu.memory_space<vmem>>) attributes {dimension_semantics = [#tpu.dimension_semantics<parallel>], iteration_bounds = array<i64: 1>, scalar_prefetch = 0 : i64, scratch_operands = 0 : i64, tpu.core_type = #tpu.core_type<tc>, window_params = [{transform_indices = @transform_0, window_bounds = array<i64: 8, 1024>}, {pipeline_mode = #tpu.pipeline_mode<synchronous>, transform_indices = @transform_1, window_bounds = array<i64: 1024, 512>}, {pipeline_mode = #tpu.pipeline_mode<synchronous>, transform_indices = @transform_2, window_bounds = array<i64: 1, 512>}, {pipeline_mode = #tpu.pipeline_mode<synchronous>, transform_indices = @transform_3, window_bounds = array<i64: 512, 256>}, {pipeline_mode = #tpu.pipeline_mode<synchronous>, transform_indices = @transform_4, window_bounds = array<i64: 1, 256>}, {pipeline_mode = #tpu.pipeline_mode<synchronous>, transform_indices = @transform_5, window_bounds = array<i64: 1, 256>}, {pipeline_mode = #tpu.pipeline_mode<synchronous>, transform_indices = @transform_6, window_bounds = array<i64: 1, 1>}, {transform_indices = @transform_7, window_bounds = array<i64: 1, 1, 8>}]} {
    %c0 = arith.constant 0 : index
    %c0_0 = arith.constant 0 : index
    %0 = vector.load %arg1[%c0, %c0_0] : memref<8x1024xf32, #tpu.memory_space<vmem>>, vector<8x1024xf32>
    %c0_1 = arith.constant 0 : index
    %c0_2 = arith.constant 0 : index
    %1 = vector.load %arg2[%c0_1, %c0_2] : memref<1024x512xf32, #tpu.memory_space<vmem>>, vector<1024x512xf32>
    %cst = arith.constant dense<0.000000e+00> : vector<8x512xf32>
    %2 = tpu.matmul %0, %1, %cst {dimension_numbers = #tpu.dot_dimension_numbers<[1], [0], [0], [1], [0, 0, 1, 1], [], []>} : vector<8x1024xf32>, vector<1024x512xf32>, vector<8x512xf32> -> vector<8x512xf32>
    %c0_3 = arith.constant 0 : index
    %c0_4 = arith.constant 0 : index
    %3 = vector.load %arg3[%c0_3, %c0_4] : memref<1x512xf32, #tpu.memory_space<vmem>>, vector<1x512xf32>
    %4 = vector.broadcast %3 : vector<1x512xf32> to vector<8x512xf32>
    %5 = arith.addf %2, %4 : vector<8x512xf32>
    %cst_5 = arith.constant 0.000000e+00 : f32
    %6 = vector.broadcast %cst_5 : f32 to vector<8x512xf32>
    %7 = arith.maximumf %5, %6 : vector<8x512xf32>
    %c0_6 = arith.constant 0 : index
    %c0_7 = arith.constant 0 : index
    %8 = vector.load %arg4[%c0_6, %c0_7] : memref<512x256xf32, #tpu.memory_space<vmem>>, vector<512x256xf32>
    %cst_8 = arith.constant dense<0.000000e+00> : vector<8x256xf32>
    %9 = tpu.matmul %7, %8, %cst_8 {dimension_numbers = #tpu.dot_dimension_numbers<[1], [0], [0], [1], [0, 0, 1, 1], [], []>} : vector<8x512xf32>, vector<512x256xf32>, vector<8x256xf32> -> vector<8x256xf32>
    %c0_9 = arith.constant 0 : index
    %c0_10 = arith.constant 0 : index
    %10 = vector.load %arg5[%c0_9, %c0_10] : memref<1x256xf32, #tpu.memory_space<vmem>>, vector<1x256xf32>
    %11 = vector.broadcast %10 : vector<1x256xf32> to vector<8x256xf32>
    %12 = arith.addf %9, %11 : vector<8x256xf32>
    %cst_11 = arith.constant 0.000000e+00 : f32
    %13 = vector.broadcast %cst_11 : f32 to vector<8x256xf32>
    %14 = arith.maximumf %12, %13 : vector<8x256xf32>
    %c0_12 = arith.constant 0 : index
    %c0_13 = arith.constant 0 : index
    %15 = vector.load %arg6[%c0_12, %c0_13] : memref<1x256xf32, #tpu.memory_space<vmem>>, vector<1x256xf32>
    %cst_14 = arith.constant dense<0.000000e+00> : vector<1x8xf32>
    %16 = tpu.matmul %15, %14, %cst_14 {dimension_numbers = #tpu.dot_dimension_numbers<[1], [1], [0], [0], [0, 0, 1, 0], [], []>} : vector<1x256xf32>, vector<8x256xf32>, vector<1x8xf32> -> vector<1x8xf32>
    %c0_15 = arith.constant 0 : index
    %c0_16 = arith.constant 0 : index
    %17 = vector.load %arg7[%c0_15, %c0_16] : memref<1x1xf32, #tpu.memory_space<vmem>>, vector<1x1xf32>
    %18 = vector.broadcast %17 : vector<1x1xf32> to vector<1x8xf32>
    %19 = arith.addf %16, %18 : vector<1x8xf32>
    %20 = math.absf %19 : vector<1x8xf32>
    %cst_17 = arith.constant 0.000000e+00 : f32
    %21 = vector.broadcast %cst_17 : f32 to vector<1x8xf32>
    %22 = arith.subf %21, %20 : vector<1x8xf32>
    %23 = math.exp %22 : vector<1x8xf32>
    %cst_18 = arith.constant 1.000000e+00 : f32
    %24 = vector.broadcast %cst_18 : f32 to vector<1x8xf32>
    %25 = arith.addf %24, %23 : vector<1x8xf32>
    %cst_19 = arith.constant 1.000000e+00 : f32
    %26 = vector.broadcast %cst_19 : f32 to vector<1x8xf32>
    %27 = arith.divf %26, %25 : vector<1x8xf32>
    %cst_20 = arith.constant 0.000000e+00 : f32
    %28 = vector.broadcast %cst_20 : f32 to vector<1x8xf32>
    %29 = arith.cmpf oge, %19, %28 : vector<1x8xf32>
    %30 = arith.mulf %23, %27 : vector<1x8xf32>
    %31 = arith.select %29, %27, %30 : vector<1x8xi1>, vector<1x8xf32>
    %32 = vector.shape_cast %31 : vector<1x8xf32> to vector<1x1x8xf32>
    %c0_21 = arith.constant 0 : index
    %c0_22 = arith.constant 0 : index
    %c0_23 = arith.constant 0 : index
    %33 = vector.load %arg8[%c0_21, %c0_22, %c0_23] : memref<1x1x8xf32, #tpu.memory_space<vmem>>, vector<1x1x8xf32>
    tpu.vector_store %arg8[%c0_21, %c0_22, %c0_23], %32 {strides = array<i32>} : memref<1x1x8xf32, #tpu.memory_space<vmem>>, vector<1x1x8xf32>,
    return
  }
  func.func @transform_0(%arg0: i32) -> (i32, i32) {
    %c0_i32 = arith.constant 0 : i32
    %c0_i32_0 = arith.constant 0 : i32
    return %arg0, %c0_i32 : i32, i32
  }
  func.func @transform_1(%arg0: i32) -> (i32, i32) {
    %c0_i32 = arith.constant 0 : i32
    %c0_i32_0 = arith.constant 0 : i32
    %c0_i32_1 = arith.constant 0 : i32
    return %c0_i32, %c0_i32_0 : i32, i32
  }
  func.func @transform_2(%arg0: i32) -> (i32, i32) {
    %c0_i32 = arith.constant 0 : i32
    %c0_i32_0 = arith.constant 0 : i32
    %c0_i32_1 = arith.constant 0 : i32
    return %c0_i32, %c0_i32_0 : i32, i32
  }
  func.func @transform_3(%arg0: i32) -> (i32, i32) {
    %c0_i32 = arith.constant 0 : i32
    %c0_i32_0 = arith.constant 0 : i32
    %c0_i32_1 = arith.constant 0 : i32
    return %c0_i32, %c0_i32_0 : i32, i32
  }
  func.func @transform_4(%arg0: i32) -> (i32, i32) {
    %c0_i32 = arith.constant 0 : i32
    %c0_i32_0 = arith.constant 0 : i32
    %c0_i32_1 = arith.constant 0 : i32
    return %c0_i32, %c0_i32_0 : i32, i32
  }
  func.func @transform_5(%arg0: i32) -> (i32, i32) {
    %c0_i32 = arith.constant 0 : i32
    %c0_i32_0 = arith.constant 0 : i32
    %c0_i32_1 = arith.constant 0 : i32
    return %c0_i32, %c0_i32_0 : i32, i32
  }
  func.func @transform_6(%arg0: i32) -> (i32, i32) {
    %c0_i32 = arith.constant 0 : i32
    %c0_i32_0 = arith.constant 0 : i32
    %c0_i32_1 = arith.constant 0 : i32
    return %c0_i32, %c0_i32_0 : i32, i32
  }
  func.func @transform_7(%arg0: i32) -> (i32, i32, i32) {
    %c0_i32 = arith.constant 0 : i32
    %c0_i32_0 = arith.constant 0 : i32
    %c0_i32_1 = arith.constant 0 : i32
    return %arg0, %c0_i32, %c0_i32_0 : i32, i32, i32
  }
}

</mosaic_0001>

<bundles_post_ra>
// kernel: tpu_custom_call.1
= control target key start
LH: loop header
LB: loop body
LE: loop exit
PB: predicated region body
PF: predicated region fallthrough
CT: control target
= control target key end

     0   :  { %s1897_s0 = inlined_call_operand.hbm [shape: f32[8,1024], index: 0, kind: input, shape index: {}]   ;;  %s1898_s1 = inlined_call_operand.hbm [shape: f32[1024,512], index: 1, kind: input, shape index: {}]   ;;  %s1899_s2 = inlined_call_operand.hbm [shape: f32[1,512], index: 2, kind: input, shape index: {}]   ;;  %s1900_s3 = inlined_call_operand.hbm [shape: f32[512,256], index: 3, kind: input, shape index: {}]   ;;  %s1901_s4 = inlined_call_operand.hbm [shape: f32[1,256], index: 4, kind: input, shape index: {}]   ;;  %s1902_s5 = inlined_call_operand.hbm [shape: f32[1,256], index: 5, kind: input, shape index: {}]   ;;  %s1903_s6 = inlined_call_operand.<no memory space> [shape: f32[1,1], index: 6, kind: input, shape index: {}]   ;;  %s1904_s7 = inlined_call_operand.hbm [shape: f32[1,1,8], index: 7, kind: output, shape index: {}]  }
   0x1   :  { %v12_v0 = vstv %s1903_s6 }
   0x2   :  { %13 = vst [vmem:[#allocation2] sm:$0x1] %v12_v0 }
   0x3   :  { %14 = vsyncpa [#allocation4], 0 }
   0x4   :  { %15 = vsyncpa [#allocation7], 0 }
   0x5   :  { %16 = vsyncpa [#allocation10], 0 }
   0x6   :  { %17 = vsyncpa [#allocation13], 0 }
   0x7   :  { %18 = vsyncpa [#allocation5], 0  ;;  %s1798_s26 = smov [#allocation6]  }
   0x8   :  { %s34_s27 = sshll.u32 %s1798_s26, 4  ;;  %s35_s27 = int_to_ptr.vmem [resolvable:$true] %s34_s27 }
   0x9   :  { %s1656_s28 = scalar_lea.vmem %s35_s27, 65536  ;;  %p1661_p1 = scmp.lt.s32.totalorder %s35_s27, %s35_s27 }
   0xa   :  { %p1657_p0 = scmp.ne.s32.totalorder %s35_s27, %s1656_s28  ;;  %p1662_p2 = scmp.lt.s32.totalorder %s1656_s28, %s1656_s28 }
   0xc   :  { %p1663_p3 = por %p1662_p2, %p1661_p1 }
   0xe   :  { %p1664_p4 = pnand %p1663_p3, %p1657_p0 }
  0x10   :  { %1667 = shalt.err (!%p1664_p4)
}
  0x11   :  { %s1799_s29 = smov 512   ;;  %s1800_s30 = smov 32  }
  0x12   :  { %40 = dma.hbm_to_vmem [thread:$0]  %s1898_s1, 65536, %s35_s27, [#allocation7], %s1799_s29, %s1799_s29, %s1800_s30  }
  0x13   :  { %s1801_s9 = smov [#allocation9]  }
  0x14   :  { %s56_s10 = sshll.u32 %s1801_s9, 4  ;;  %s57_s10 = int_to_ptr.vmem [resolvable:$true] %s56_s10 }
  0x15   :  { %s1676_s11 = scalar_lea.vmem %s57_s10, 16384  ;;  %p1681_p6 = scmp.lt.s32.totalorder %s57_s10, %s57_s10 }
  0x16   :  { %p1677_p5 = scmp.ne.s32.totalorder %s57_s10, %s1676_s11  ;;  %p1682_p7 = scmp.lt.s32.totalorder %s1676_s11, %s1676_s11 }
  0x18   :  { %p1683_p8 = por %p1682_p7, %p1681_p6 }
  0x1a   :  { %p1684_p9 = pnand %p1683_p8, %p1677_p5 }
  0x1c   :  { %1687 = shalt.err (!%p1684_p9)
}
  0x1d   :  { %s1802_s12 = smov 256   ;;  %s1803_s13 = smov 16  }
  0x1e   :  { %62 = dma.hbm_to_vmem [thread:$0]  %s1900_s3, 16384, %s57_s10, [#allocation10], %s1802_s12, %s1802_s12, %s1803_s13  }
  0x1f   :  { %s1804_s16 = smov [#allocation3]   ;;  %s1805_s18 = smov [#allocation8]  }
  0x20   :  { %s25_s17 = sshll.u32 %s1804_s16, 4  ;;  %s47_s1 = sshll.u32 %s1805_s18, 4  ;;  %s26_s17 = int_to_ptr.vmem [resolvable:$true] %s25_s17  ;;  %s48_s1 = int_to_ptr.vmem [resolvable:$true] %s47_s1 }
  0x21   :  { %s1696_s19 = scalar_lea.vmem %s26_s17, 1024  ;;  %p1701_p11 = scmp.lt.s32.totalorder %s26_s17, %s26_s17 }
  0x22   :  { %p1697_p10 = scmp.ne.s32.totalorder %s26_s17, %s1696_s19  ;;  %p1702_p12 = scmp.lt.s32.totalorder %s1696_s19, %s1696_s19 }
  0x24   :  { %p1703_p13 = por %p1702_p12, %p1701_p11 }
  0x26   :  { %p1704_p0 = pnand %p1703_p13, %p1697_p10 }
  0x28   :  { %1707 = shalt.err (!%p1704_p0)
}
  0x29   :  { %28 = dma.hbm_to_vmem [thread:$0]  %s1897_s0, 1024, %s26_s17, [#allocation4]  }
  0x2a   :  { %s1716_s22 = scalar_lea.vmem %s48_s1, 64  ;;  %p1721_p2 = scmp.lt.s32.totalorder %s48_s1, %s48_s1 }
  0x2b   :  { %p1717_p1 = scmp.ne.s32.totalorder %s48_s1, %s1716_s22  ;;  %p1722_p3 = scmp.lt.s32.totalorder %s1716_s22, %s1716_s22 }
  0x2d   :  { %p1723_p4 = por %p1722_p3, %p1721_p2 }
  0x2f   :  { %p1724_p5 = pnand %p1723_p4, %p1717_p1 }
  0x31   :  { %1727 = shalt.err (!%p1724_p5)
}
  0x32   :  { %50 = dma.hbm_to_vmem [thread:$0]  %s1899_s2, 64, %s48_s1, [#allocation7]  }
  0x33   :  { %s1806_s24 = smov [#allocation11]   ;;  %s1807_s26 = smov [#allocation12]  }
  0x34   :  { %s69_s25 = sshll.u32 %s1806_s24, 4  ;;  %s79_s27 = sshll.u32 %s1807_s26, 4  ;;  %s70_s25 = int_to_ptr.vmem [resolvable:$true] %s69_s25  ;;  %s80_s27 = int_to_ptr.vmem [resolvable:$true] %s79_s27 }
  0x35   :  { %s1736_s28 = scalar_lea.vmem %s70_s25, 32  ;;  %p1741_p7 = scmp.lt.s32.totalorder %s70_s25, %s70_s25 }
  0x36   :  { %p1737_p6 = scmp.ne.s32.totalorder %s70_s25, %s1736_s28  ;;  %p1742_p8 = scmp.lt.s32.totalorder %s1736_s28, %s1736_s28 }
  0x38   :  { %p1743_p9 = por %p1742_p8, %p1741_p7 }
  0x3a   :  { %p1744_p10 = pnand %p1743_p9, %p1737_p6 }
  0x3c   :  { %1747 = shalt.err (!%p1744_p10)
}
  0x3d   :  { %72 = dma.hbm_to_vmem [thread:$0]  %s1901_s4, 32, %s70_s25, [#allocation10]  }
  0x3e   :  { %s1756_s30 = scalar_lea.vmem %s80_s27, 32  ;;  %p1761_p12 = scmp.lt.s32.totalorder %s80_s27, %s80_s27 }
  0x3f   :  { %p1757_p11 = scmp.ne.s32.totalorder %s80_s27, %s1756_s30  ;;  %p1762_p13 = scmp.lt.s32.totalorder %s1756_s30, %s1756_s30 }
  0x41   :  { %p1763_p0 = por %p1762_p13, %p1761_p12 }
  0x43   :  { %p1764_p1 = pnand %p1763_p0, %p1757_p11 }
  0x45   :  { %1767 = shalt.err (!%p1764_p1)
}
  0x46   :  { %82 = dma.hbm_to_vmem [thread:$0]  %s1902_s5, 32, %s80_s27, [#allocation13]  }
  0x47   :  { %1788 = dma.done.wait [#allocation4], 1024  }
  0x48   :  { %1789 = vsyncadd [#allocation4], 4294966272 }
  0x49   :  { %1790 = dma.done.wait [#allocation7], 65600  }
  0x4a   :  { %1791 = vsyncadd [#allocation7], 4294901696 }
  0x4b   :  { %1792 = dma.done.wait [#allocation10], 16416  }
  0x4c   :  { %1793 = vsyncadd [#allocation10], 4294950880 }
  0x4d   :  { %1794 = dma.done.wait [#allocation13], 32  }
  0x4e   :  { %1795 = vsyncadd [#allocation13], 4294967264  ;;  %v172_v1 = vld [vmem:[#allocation6 + $0x1e8] sm:$0xff]  ;;  %v171_v3 = vld [vmem:[#allocation6 + $0x1e0] sm:$0xff]  ;;  %s1809_s4 = smov [#allocation14]   ;;  %vm1603_vm0 = vcmask 57344  }
  0x4f   :  { %v300_v2 = vld [vmem:[#allocation6 + $0x5e8] sm:$0xff]  ;;  %645 = vmatprep.subr.mxu0 %v172_v1  ;;  %v299_v4 = vld [vmem:[#allocation6 + $0x5e0] sm:$0xff]  ;;  %s1611_s5 = sshll.u32 %s1809_s4, 4  ;;  %s1612_s5 = int_to_ptr.vmem [resolvable:$true] %s1611_s5 }
  0x50   :  { %716 = vmatprep.subr.mxu1 %v300_v2  ;;  %v168_v5 = vld [vmem:[#allocation6 + $0x1c8] sm:$0xff]  ;;  %646 = vmatpush1.msra.mxu0 %v171_v3  ;;  %v167_v7 = vld [vmem:[#allocation6 + $0x1c0] sm:$0xff]  ;;  %s1768_s6 = scalar_lea.vmem %s1612_s5, 16  ;;  %s1772_s9 = scalar_lea.vmem %s1612_s5, 32 }
  0x51   :  { %v296_v6 = vld [vmem:[#allocation6 + $0x5c8] sm:$0xff]  ;;  %717 = vmatpush1.msra.mxu1 %v299_v4  ;;  %v295_v8 = vld [vmem:[#allocation6 + $0x5c0] sm:$0xff]  ;;  %647 = vmatprep.subr.mxu0 %v168_v5  ;;  %p1769_p2 = scmp.ne.s32.totalorder %s1612_s5, %s1768_s6  ;;  %p1773_p3 = scmp.lt.s32.totalorder %s1612_s5, %s1612_s5 }
  0x52   :  { %v164_v9 = vld [vmem:[#allocation6 + $0x1a8] sm:$0xff]  ;;  %718 = vmatprep.subr.mxu1 %v296_v6  ;;  %v163_v11 = vld [vmem:[#allocation6 + $0x1a0] sm:$0xff]  ;;  %648 = vmatpush1.msra.mxu0 %v167_v7  ;;  %p1774_p4 = scmp.lt.s32.totalorder %s1772_s9, %s1768_s6 }
  0x53   :  { %v292_v10 = vld [vmem:[#allocation6 + $0x5a8] sm:$0xff]  ;;  %v291_v12 = vld [vmem:[#allocation6 + $0x5a0] sm:$0xff]  ;;  %719 = vmatpush1.msra.mxu1 %v295_v8  ;;  %649 = vmatprep.subr.mxu0 %v164_v9 }
  0x54   :  { %v160_v13 = vld [vmem:[#allocation6 + $0x188] sm:$0xff]  ;;  %720 = vmatprep.subr.mxu1 %v292_v10  ;;  %v159_v15 = vld [vmem:[#allocation6 + $0x180] sm:$0xff]  ;;  %650 = vmatpush1.msra.mxu0 %v163_v11  ;;  %p1775_p5 = por %p1774_p4, %p1773_p3 }
  0x55   :  { %v288_v14 = vld [vmem:[#allocation6 + $0x588] sm:$0xff]  ;;  %v287_v16 = vld [vmem:[#allocation6 + $0x580] sm:$0xff]  ;;  %721 = vmatpush1.msra.mxu1 %v291_v12  ;;  %651 = vmatprep.subr.mxu0 %v160_v13 }
  0x56   :  { %v156_v17 = vld [vmem:[#allocation6 + $0x168] sm:$0xff]  ;;  %722 = vmatprep.subr.mxu1 %v288_v14  ;;  %v155_v19 = vld [vmem:[#allocation6 + $0x160] sm:$0xff]  ;;  %652 = vmatpush1.msra.mxu0 %v159_v15  ;;  %p1776_p6 = pnand %p1775_p5, %p1769_p2 }
  0x57   :  { %v284_v18 = vld [vmem:[#allocation6 + $0x568] sm:$0xff]  ;;  %v283_v20 = vld [vmem:[#allocation6 + $0x560] sm:$0xff]  ;;  %723 = vmatpush1.msra.mxu1 %v287_v16  ;;  %653 = vmatprep.subr.mxu0 %v156_v17 }
  0x58   :  { %v152_v21 = vld [vmem:[#allocation6 + $0x148] sm:$0xff]  ;;  %724 = vmatprep.subr.mxu1 %v284_v18  ;;  %v151_v23 = vld [vmem:[#allocation6 + $0x140] sm:$0xff]  ;;  %654 = vmatpush1.msra.mxu0 %v155_v19 }
  0x59   :  { %v280_v22 = vld [vmem:[#allocation6 + $0x548] sm:$0xff]  ;;  %v279_v24 = vld [vmem:[#allocation6 + $0x540] sm:$0xff]  ;;  %725 = vmatpush1.msra.mxu1 %v283_v20  ;;  %655 = vmatprep.subr.mxu0 %v152_v21 }
  0x5a   :  { %v148_v25 = vld [vmem:[#allocation6 + $0x128] sm:$0xff]  ;;  %726 = vmatprep.subr.mxu1 %v280_v22  ;;  %v147_v27 = vld [vmem:[#allocation6 + $0x120] sm:$0xff]  ;;  %656 = vmatpush1.msra.mxu0 %v151_v23 }
  0x5b   :  { %v276_v26 = vld [vmem:[#allocation6 + $0x528] sm:$0xff]  ;;  %v275_v28 = vld [vmem:[#allocation6 + $0x520] sm:$0xff]  ;;  %727 = vmatpush1.msra.mxu1 %v279_v24  ;;  %657 = vmatprep.subr.mxu0 %v148_v25 }
  0x5c   :  { %v144_v29 = vld [vmem:[#allocation6 + $0x108] sm:$0xff]  ;;  %728 = vmatprep.subr.mxu1 %v276_v26  ;;  %v143_v31 = vld [vmem:[#allocation6 + $0x100] sm:$0xff]  ;;  %658 = vmatpush1.msra.mxu0 %v147_v27 }
  0x5d   :  { %v272_v30 = vld [vmem:[#allocation6 + $0x508] sm:$0xff]  ;;  %v271_v32 = vld [vmem:[#allocation6 + $0x500] sm:$0xff]  ;;  %729 = vmatpush1.msra.mxu1 %v275_v28  ;;  %659 = vmatprep.subr.mxu0 %v144_v29 }
  0x5e   :  { %v140_v33 = vld [vmem:[#allocation6 + $0xe8] sm:$0xff]  ;;  %730 = vmatprep.subr.mxu1 %v272_v30  ;;  %v139_v35 = vld [vmem:[#allocation6 + $0xe0] sm:$0xff]  ;;  %660 = vmatpush1.msra.mxu0 %v143_v31 }
  0x5f   :  { %v268_v34 = vld [vmem:[#allocation6 + $0x4e8] sm:$0xff]  ;;  %v267_v36 = vld [vmem:[#allocation6 + $0x4e0] sm:$0xff]  ;;  %731 = vmatpush1.msra.mxu1 %v271_v32  ;;  %661 = vmatprep.subr.mxu0 %v140_v33 }
  0x60   :  { %v136_v37 = vld [vmem:[#allocation6 + $0xc8] sm:$0xff]  ;;  %732 = vmatprep.subr.mxu1 %v268_v34  ;;  %v135_v39 = vld [vmem:[#allocation6 + $0xc0] sm:$0xff]  ;;  %662 = vmatpush1.msra.mxu0 %v139_v35 }
  0x61   :  { %v264_v38 = vld [vmem:[#allocation6 + $0x4c8] sm:$0xff]  ;;  %v263_v40 = vld [vmem:[#allocation6 + $0x4c0] sm:$0xff]  ;;  %733 = vmatpush1.msra.mxu1 %v267_v36  ;;  %663 = vmatprep.subr.mxu0 %v136_v37 }
  0x62   :  { %v132_v41 = vld [vmem:[#allocation6 + $0xa8] sm:$0xff]  ;;  %734 = vmatprep.subr.mxu1 %v264_v38  ;;  %v131_v43 = vld [vmem:[#allocation6 + $0xa0] sm:$0xff]  ;;  %664 = vmatpush1.msra.mxu0 %v135_v39 }
  0x63   :  { %v260_v42 = vld [vmem:[#allocation6 + $0x4a8] sm:$0xff]  ;;  %v259_v44 = vld [vmem:[#allocation6 + $0x4a0] sm:$0xff]  ;;  %735 = vmatpush1.msra.mxu1 %v263_v40  ;;  %665 = vmatprep.subr.mxu0 %v132_v41 }
  0x64   :  { %v128_v45 = vld [vmem:[#allocation6 + $0x88] sm:$0xff]  ;;  %736 = vmatprep.subr.mxu1 %v260_v42  ;;  %v127_v47 = vld [vmem:[#allocation6 + $0x80] sm:$0xff]  ;;  %666 = vmatpush1.msra.mxu0 %v131_v43 }
  0x65   :  { %v256_v46 = vld [vmem:[#allocation6 + $0x488] sm:$0xff]  ;;  %v255_v48 = vld [vmem:[#allocation6 + $0x480] sm:$0xff]  ;;  %737 = vmatpush1.msra.mxu1 %v259_v44  ;;  %667 = vmatprep.subr.mxu0 %v128_v45 }
  0x66   :  { %v124_v49 = vld [vmem:[#allocation6 + $0x68] sm:$0xff]  ;;  %738 = vmatprep.subr.mxu1 %v256_v46  ;;  %v123_v51 = vld [vmem:[#allocation6 + $0x60] sm:$0xff]  ;;  %668 = vmatpush1.msra.mxu0 %v127_v47 }
  0x67   :  { %v252_v50 = vld [vmem:[#allocation6 + $0x468] sm:$0xff]  ;;  %v251_v52 = vld [vmem:[#allocation6 + $0x460] sm:$0xff]  ;;  %739 = vmatpush1.msra.mxu1 %v255_v48  ;;  %669 = vmatprep.subr.mxu0 %v124_v49 }
  0x68   :  { %v120_v53 = vld [vmem:[#allocation6 + $0x48] sm:$0xff]  ;;  %740 = vmatprep.subr.mxu1 %v252_v50  ;;  %v119_v55 = vld [vmem:[#allocation6 + $0x40] sm:$0xff]  ;;  %670 = vmatpush1.msra.mxu0 %v123_v51 }
  0x69   :  { %v248_v54 = vld [vmem:[#allocation6 + $0x448] sm:$0xff]  ;;  %v247_v56 = vld [vmem:[#allocation6 + $0x440] sm:$0xff]  ;;  %741 = vmatpush1.msra.mxu1 %v251_v52  ;;  %671 = vmatprep.subr.mxu0 %v120_v53 }
  0x6a   :  { %v116_v57 = vld [vmem:[#allocation6 + $0x28] sm:$0xff]  ;;  %742 = vmatprep.subr.mxu1 %v248_v54  ;;  %v115_v59 = vld [vmem:[#allocation6 + $0x20] sm:$0xff]  ;;  %672 = vmatpush1.msra.mxu0 %v119_v55 }
  0x6b   :  { %v244_v58 = vld [vmem:[#allocation6 + $0x428] sm:$0xff]  ;;  %v243_v60 = vld [vmem:[#allocation6 + $0x420] sm:$0xff]  ;;  %743 = vmatpush1.msra.mxu1 %v247_v56  ;;  %673 = vmatprep.subr.mxu0 %v116_v57 }
  0x6c   :  { %v112_v61 = vld [vmem:[#allocation6 + $0x8] sm:$0xff]  ;;  %744 = vmatprep.subr.mxu1 %v244_v58  ;;  %v111_v63 = vld [vmem:[#allocation6] sm:$0xff]  ;;  %674 = vmatpush1.msra.mxu0 %v115_v59 }
  0x6d   :  { %v240_v62 = vld [vmem:[#allocation6 + $0x408] sm:$0xff]  ;;  %v239_v0 = vld [vmem:[#allocation6 + $0x400] sm:$0xff]  ;;  %745 = vmatpush1.msra.mxu1 %v243_v60  ;;  %675 = vmatprep.subr.mxu0 %v112_v61 }
  0x6e   :  { %v236_v1 = vld [vmem:[#allocation6 + $0x3e8] sm:$0xff]  ;;  %746 = vmatprep.subr.mxu1 %v240_v62  ;;  %v235_v3 = vld [vmem:[#allocation6 + $0x3e0] sm:$0xff]  ;;  %676 = vmatpush1.msra.mxu0 %v111_v63 }
  0x6f   :  { %v364_v2 = vld [vmem:[#allocation6 + $0x7e8] sm:$0xff]  ;;  %v363_v4 = vld [vmem:[#allocation6 + $0x7e0] sm:$0xff]  ;;  %747 = vmatpush1.msra.mxu1 %v239_v0  ;;  %677 = vmatprep.subr.mxu0 %v236_v1 }
  0x70   :  { %v232_v5 = vld [vmem:[#allocation6 + $0x3c8] sm:$0xff]  ;;  %748 = vmatprep.subr.mxu1 %v364_v2  ;;  %v231_v7 = vld [vmem:[#allocation6 + $0x3c0] sm:$0xff]  ;;  %678 = vmatpush2.msra.mxu0 %v235_v3  ;;  %v106_v3 = vld [vmem:[#allocation3 + $0x18] sm:$0xff] }
  0x71   :  { %v360_v6 = vld [vmem:[#allocation6 + $0x7c8] sm:$0xff]  ;;  %v359_v8 = vld [vmem:[#allocation6 + $0x7c0] sm:$0xff]  ;;  %749 = vmatpush2.msra.mxu1 %v363_v4  ;;  %679 = vmatprep.subr.mxu0 %v232_v5 }
  0x72   :  { %v228_v9 = vld [vmem:[#allocation6 + $0x3a8] sm:$0xff]  ;;  %750 = vmatprep.subr.mxu1 %v360_v6  ;;  %v227_v11 = vld [vmem:[#allocation6 + $0x3a0] sm:$0xff]  ;;  %680 = vmatpush2.msra.mxu0 %v231_v7  ;;  %v105_v6 = vld [vmem:[#allocation3 + $0x10] sm:$0xff] }
  0x73   :  { %v356_v10 = vld [vmem:[#allocation6 + $0x7a8] sm:$0xff]  ;;  %v355_v12 = vld [vmem:[#allocation6 + $0x7a0] sm:$0xff]  ;;  %751 = vmatpush2.msra.mxu1 %v359_v8  ;;  %681 = vmatprep.subr.mxu0 %v228_v9 }
  0x74   :  { %v224_v13 = vld [vmem:[#allocation6 + $0x388] sm:$0xff]  ;;  %752 = vmatprep.subr.mxu1 %v356_v10  ;;  %v223_v15 = vld [vmem:[#allocation6 + $0x380] sm:$0xff]  ;;  %682 = vmatpush2.msra.mxu0 %v227_v11 }
  0x75   :  { %v352_v14 = vld [vmem:[#allocation6 + $0x788] sm:$0xff]  ;;  %v351_v16 = vld [vmem:[#allocation6 + $0x780] sm:$0xff]  ;;  %753 = vmatpush2.msra.mxu1 %v355_v12  ;;  %683 = vmatprep.subr.mxu0 %v224_v13 }
  0x76   :  { %v220_v17 = vld [vmem:[#allocation6 + $0x368] sm:$0xff]  ;;  %754 = vmatprep.subr.mxu1 %v352_v14  ;;  %v219_v19 = vld [vmem:[#allocation6 + $0x360] sm:$0xff]  ;;  %684 = vmatpush2.msra.mxu0 %v223_v15 }
  0x77   :  { %v348_v18 = vld [vmem:[#allocation6 + $0x768] sm:$0xff]  ;;  %v347_v20 = vld [vmem:[#allocation6 + $0x760] sm:$0xff]  ;;  %755 = vmatpush2.msra.mxu1 %v351_v16  ;;  %685 = vmatprep.subr.mxu0 %v220_v17 }
  0x78   :  { %v216_v21 = vld [vmem:[#allocation6 + $0x348] sm:$0xff]  ;;  %756 = vmatprep.subr.mxu1 %v348_v18  ;;  %v215_v23 = vld [vmem:[#allocation6 + $0x340] sm:$0xff]  ;;  %686 = vmatpush2.msra.mxu0 %v219_v19 }
  0x79   :  { %v344_v22 = vld [vmem:[#allocation6 + $0x748] sm:$0xff]  ;;  %v343_v24 = vld [vmem:[#allocation6 + $0x740] sm:$0xff]  ;;  %757 = vmatpush2.msra.mxu1 %v347_v20  ;;  %687 = vmatprep.subr.mxu0 %v216_v21 }
  0x7a   :  { %v212_v25 = vld [vmem:[#allocation6 + $0x328] sm:$0xff]  ;;  %758 = vmatprep.subr.mxu1 %v344_v22  ;;  %v211_v27 = vld [vmem:[#allocation6 + $0x320] sm:$0xff]  ;;  %688 = vmatpush2.msra.mxu0 %v215_v23 }
  0x7b   :  { %v340_v26 = vld [vmem:[#allocation6 + $0x728] sm:$0xff]  ;;  %v339_v28 = vld [vmem:[#allocation6 + $0x720] sm:$0xff]  ;;  %759 = vmatpush2.msra.mxu1 %v343_v24  ;;  %689 = vmatprep.subr.mxu0 %v212_v25 }
  0x7c   :  { %v208_v29 = vld [vmem:[#allocation6 + $0x308] sm:$0xff]  ;;  %760 = vmatprep.subr.mxu1 %v340_v26  ;;  %v207_v31 = vld [vmem:[#allocation6 + $0x300] sm:$0xff]  ;;  %690 = vmatpush2.msra.mxu0 %v211_v27 }
  0x7d   :  { %v336_v30 = vld [vmem:[#allocation6 + $0x708] sm:$0xff]  ;;  %v335_v32 = vld [vmem:[#allocation6 + $0x700] sm:$0xff]  ;;  %761 = vmatpush2.msra.mxu1 %v339_v28  ;;  %691 = vmatprep.subr.mxu0 %v208_v29 }
  0x7e   :  { %v204_v33 = vld [vmem:[#allocation6 + $0x2e8] sm:$0xff]  ;;  %762 = vmatprep.subr.mxu1 %v336_v30  ;;  %v203_v35 = vld [vmem:[#allocation6 + $0x2e0] sm:$0xff]  ;;  %692 = vmatpush2.msra.mxu0 %v207_v31 }
  0x7f   :  { %v332_v34 = vld [vmem:[#allocation6 + $0x6e8] sm:$0xff]  ;;  %v331_v36 = vld [vmem:[#allocation6 + $0x6e0] sm:$0xff]  ;;  %763 = vmatpush2.msra.mxu1 %v335_v32  ;;  %693 = vmatprep.subr.mxu0 %v204_v33 }
  0x80   :  { %v200_v37 = vld [vmem:[#allocation6 + $0x2c8] sm:$0xff]  ;;  %764 = vmatprep.subr.mxu1 %v332_v34  ;;  %v199_v39 = vld [vmem:[#allocation6 + $0x2c0] sm:$0xff]  ;;  %694 = vmatpush2.msra.mxu0 %v203_v35 }
  0x81   :  { %v328_v38 = vld [vmem:[#allocation6 + $0x6c8] sm:$0xff]  ;;  %v327_v40 = vld [vmem:[#allocation6 + $0x6c0] sm:$0xff]  ;;  %765 = vmatpush2.msra.mxu1 %v331_v36  ;;  %695 = vmatprep.subr.mxu0 %v200_v37 }
  0x82   :  { %v196_v41 = vld [vmem:[#allocation6 + $0x2a8] sm:$0xff]  ;;  %766 = vmatprep.subr.mxu1 %v328_v38  ;;  %v195_v43 = vld [vmem:[#allocation6 + $0x2a0] sm:$0xff]  ;;  %696 = vmatpush2.msra.mxu0 %v199_v39 }
  0x83   :  { %v324_v42 = vld [vmem:[#allocation6 + $0x6a8] sm:$0xff]  ;;  %v323_v44 = vld [vmem:[#allocation6 + $0x6a0] sm:$0xff]  ;;  %767 = vmatpush2.msra.mxu1 %v327_v40  ;;  %697 = vmatprep.subr.mxu0 %v196_v41 }
  0x84   :  { %v192_v45 = vld [vmem:[#allocation6 + $0x288] sm:$0xff]  ;;  %768 = vmatprep.subr.mxu1 %v324_v42  ;;  %v191_v47 = vld [vmem:[#allocation6 + $0x280] sm:$0xff]  ;;  %698 = vmatpush2.msra.mxu0 %v195_v43 }
  0x85   :  { %v320_v46 = vld [vmem:[#allocation6 + $0x688] sm:$0xff]  ;;  %v319_v48 = vld [vmem:[#allocation6 + $0x680] sm:$0xff]  ;;  %769 = vmatpush2.msra.mxu1 %v323_v44  ;;  %699 = vmatprep.subr.mxu0 %v192_v45 }
  0x86   :  { %v188_v49 = vld [vmem:[#allocation6 + $0x268] sm:$0xff]  ;;  %770 = vmatprep.subr.mxu1 %v320_v46  ;;  %v187_v51 = vld [vmem:[#allocation6 + $0x260] sm:$0xff]  ;;  %700 = vmatpush2.msra.mxu0 %v191_v47 }
  0x87   :  { %v316_v50 = vld [vmem:[#allocation6 + $0x668] sm:$0xff]  ;;  %v315_v52 = vld [vmem:[#allocation6 + $0x660] sm:$0xff]  ;;  %771 = vmatpush2.msra.mxu1 %v319_v48  ;;  %701 = vmatprep.subr.mxu0 %v188_v49 }
  0x88   :  { %v184_v53 = vld [vmem:[#allocation6 + $0x248] sm:$0xff]  ;;  %772 = vmatprep.subr.mxu1 %v316_v50  ;;  %v183_v55 = vld [vmem:[#allocation6 + $0x240] sm:$0xff]  ;;  %702 = vmatpush2.msra.mxu0 %v187_v51 }
  0x89   :  { %v312_v54 = vld [vmem:[#allocation6 + $0x648] sm:$0xff]  ;;  %v311_v56 = vld [vmem:[#allocation6 + $0x640] sm:$0xff]  ;;  %773 = vmatpush2.msra.mxu1 %v315_v52  ;;  %703 = vmatprep.subr.mxu0 %v184_v53 }
  0x8a   :  { %v180_v57 = vld [vmem:[#allocation6 + $0x228] sm:$0xff]  ;;  %774 = vmatprep.subr.mxu1 %v312_v54  ;;  %v179_v59 = vld [vmem:[#allocation6 + $0x220] sm:$0xff]  ;;  %704 = vmatpush2.msra.mxu0 %v183_v55 }
  0x8b   :  { %v308_v58 = vld [vmem:[#allocation6 + $0x628] sm:$0xff]  ;;  %v307_v60 = vld [vmem:[#allocation6 + $0x620] sm:$0xff]  ;;  %775 = vmatpush2.msra.mxu1 %v311_v56  ;;  %705 = vmatprep.subr.mxu0 %v180_v57 }
  0x8c   :  { %v176_v61 = vld [vmem:[#allocation6 + $0x208] sm:$0xff]  ;;  %776 = vmatprep.subr.mxu1 %v308_v58  ;;  %v175_v63 = vld [vmem:[#allocation6 + $0x200] sm:$0xff]  ;;  %706 = vmatpush2.msra.mxu0 %v179_v59 }
  0x8d   :  { %v304_v62 = vld [vmem:[#allocation6 + $0x608] sm:$0xff]  ;;  %777 = vmatpush2.msra.mxu1 %v307_v60  ;;  %v303_v1 = vld [vmem:[#allocation6 + $0x600] sm:$0xff]  ;;  %707 = vmatprep.subr.mxu0 %v176_v61 }
  0x8e   :  { %v104_v0 = vld [vmem:[#allocation3 + $0x8] sm:$0xff]  ;;  %v103_v2 = vld [vmem:[#allocation3] sm:$0xff]  ;;  %778 = vmatprep.subr.mxu1 %v304_v62  ;;  %708 = vmatpush2.msra.mxu0 %v175_v63 }
  0x8f   :  { %v428_v4 = vld [vmem:[#allocation6 + $0x9e8] sm:$0xff]  ;;  %709 = vmatprep.mubr.f32.mxu0 %v104_v0  ;;  %779 = vmatpush2.msra.mxu1 %v303_v1  ;;  %v427_v7 = vld [vmem:[#allocation6 + $0x9e0] sm:$0xff] }
  0x90   :  { %v556_v5 = vld [vmem:[#allocation6 + $0xde8] sm:$0xff]  ;;  %710 = vmatmul.mubr.f32.vlgmr.msra.gmra.mxu0 %v103_v2  ;;  %v555_v8 = vld [vmem:[#allocation6 + $0xde0] sm:$0xff]  ;;  %780 = vmatprep.mubr.f32.mxu1 %v106_v3 }
  0x91   :  { %787 = vmatprep.subr.mxu0 %v428_v4  ;;  %v424_v9 = vld [vmem:[#allocation6 + $0x9c8] sm:$0xff]  ;;  %858 = vmatprep.subr.mxu1 %v556_v5  ;;  %v423_v11 = vld [vmem:[#allocation6 + $0x9c0] sm:$0xff] }
  0x92   :  { %v552_v10 = vld [vmem:[#allocation6 + $0xdc8] sm:$0xff]  ;;  %781 = vmatmul.mubr.f32.vlgmr.msra.gmra.mxu1 %v105_v6  ;;  %v551_v12 = vld [vmem:[#allocation6 + $0xdc0] sm:$0xff]  ;;  %788 = vmatpush1.msra.mxu0 %v427_v7 }
  0x93   :  { %859 = vmatpush1.msra.mxu1 %v555_v8  ;;  %v420_v13 = vld [vmem:[#allocation6 + $0x9a8] sm:$0xff]  ;;  %789 = vmatprep.subr.mxu0 %v424_v9  ;;  %v419_v15 = vld [vmem:[#allocation6 + $0x9a0] sm:$0xff] }
  0x94   :  { %v548_v14 = vld [vmem:[#allocation6 + $0xda8] sm:$0xff]  ;;  %860 = vmatprep.subr.mxu1 %v552_v10  ;;  %v547_v16 = vld [vmem:[#allocation6 + $0xda0] sm:$0xff]  ;;  %790 = vmatpush1.msra.mxu0 %v423_v11 }
  0x95   :  { %861 = vmatpush1.msra.mxu1 %v551_v12  ;;  %v416_v17 = vld [vmem:[#allocation6 + $0x988] sm:$0xff]  ;;  %791 = vmatprep.subr.mxu0 %v420_v13  ;;  %v415_v19 = vld [vmem:[#allocation6 + $0x980] sm:$0xff] }
  0x96   :  { %v544_v18 = vld [vmem:[#allocation6 + $0xd88] sm:$0xff]  ;;  %862 = vmatprep.subr.mxu1 %v548_v14  ;;  %v543_v20 = vld [vmem:[#allocation6 + $0xd80] sm:$0xff]  ;;  %792 = vmatpush1.msra.mxu0 %v419_v15 }
  0x97   :  { %863 = vmatpush1.msra.mxu1 %v547_v16  ;;  %v412_v21 = vld [vmem:[#allocation6 + $0x968] sm:$0xff]  ;;  %793 = vmatprep.subr.mxu0 %v416_v17  ;;  %v411_v23 = vld [vmem:[#allocation6 + $0x960] sm:$0xff] }
  0x98   :  { %v540_v22 = vld [vmem:[#allocation6 + $0xd68] sm:$0xff]  ;;  %864 = vmatprep.subr.mxu1 %v544_v18  ;;  %v539_v24 = vld [vmem:[#allocation6 + $0xd60] sm:$0xff]  ;;  %794 = vmatpush1.msra.mxu0 %v415_v19 }
  0x99   :  { %865 = vmatpush1.msra.mxu1 %v543_v20  ;;  %v408_v25 = vld [vmem:[#allocation6 + $0x948] sm:$0xff]  ;;  %795 = vmatprep.subr.mxu0 %v412_v21  ;;  %v407_v27 = vld [vmem:[#allocation6 + $0x940] sm:$0xff] }
  0x9a   :  { %v536_v26 = vld [vmem:[#allocation6 + $0xd48] sm:$0xff]  ;;  %866 = vmatprep.subr.mxu1 %v540_v22  ;;  %v535_v28 = vld [vmem:[#allocation6 + $0xd40] sm:$0xff]  ;;  %796 = vmatpush1.msra.mxu0 %v411_v23 }
  0x9b   :  { %867 = vmatpush1.msra.mxu1 %v539_v24  ;;  %v404_v29 = vld [vmem:[#allocation6 + $0x928] sm:$0xff]  ;;  %797 = vmatprep.subr.mxu0 %v408_v25  ;;  %v403_v31 = vld [vmem:[#allocation6 + $0x920] sm:$0xff] }
  0x9c   :  { %v532_v30 = vld [vmem:[#allocation6 + $0xd28] sm:$0xff]  ;;  %868 = vmatprep.subr.mxu1 %v536_v26  ;;  %v531_v32 = vld [vmem:[#allocation6 + $0xd20] sm:$0xff]  ;;  %798 = vmatpush1.msra.mxu0 %v407_v27 }
  0x9d   :  { %869 = vmatpush1.msra.mxu1 %v535_v28  ;;  %v400_v33 = vld [vmem:[#allocation6 + $0x908] sm:$0xff]  ;;  %799 = vmatprep.subr.mxu0 %v404_v29  ;;  %v399_v35 = vld [vmem:[#allocation6 + $0x900] sm:$0xff] }
  0x9e   :  { %v528_v34 = vld [vmem:[#allocation6 + $0xd08] sm:$0xff]  ;;  %870 = vmatprep.subr.mxu1 %v532_v30  ;;  %v527_v36 = vld [vmem:[#allocation6 + $0xd00] sm:$0xff]  ;;  %800 = vmatpush1.msra.mxu0 %v403_v31 }
  0x9f   :  { %871 = vmatpush1.msra.mxu1 %v531_v32  ;;  %v396_v37 = vld [vmem:[#allocation6 + $0x8e8] sm:$0xff]  ;;  %801 = vmatprep.subr.mxu0 %v400_v33  ;;  %v395_v39 = vld [vmem:[#allocation6 + $0x8e0] sm:$0xff] }
  0xa0   :  { %v524_v38 = vld [vmem:[#allocation6 + $0xce8] sm:$0xff]  ;;  %872 = vmatprep.subr.mxu1 %v528_v34  ;;  %v523_v40 = vld [vmem:[#allocation6 + $0xce0] sm:$0xff]  ;;  %802 = vmatpush1.msra.mxu0 %v399_v35 }
  0xa1   :  { %873 = vmatpush1.msra.mxu1 %v527_v36  ;;  %v392_v41 = vld [vmem:[#allocation6 + $0x8c8] sm:$0xff]  ;;  %803 = vmatprep.subr.mxu0 %v396_v37  ;;  %v391_v43 = vld [vmem:[#allocation6 + $0x8c0] sm:$0xff] }
  0xa2   :  { %v520_v42 = vld [vmem:[#allocation6 + $0xcc8] sm:$0xff]  ;;  %874 = vmatprep.subr.mxu1 %v524_v38  ;;  %v519_v44 = vld [vmem:[#allocation6 + $0xcc0] sm:$0xff]  ;;  %804 = vmatpush1.msra.mxu0 %v395_v39 }
  0xa3   :  { %875 = vmatpush1.msra.mxu1 %v523_v40  ;;  %v388_v45 = vld [vmem:[#allocation6 + $0x8a8] sm:$0xff]  ;;  %805 = vmatprep.subr.mxu0 %v392_v41  ;;  %v387_v47 = vld [vmem:[#allocation6 + $0x8a0] sm:$0xff] }
  0xa4   :  { %v516_v46 = vld [vmem:[#allocation6 + $0xca8] sm:$0xff]  ;;  %876 = vmatprep.subr.mxu1 %v520_v42  ;;  %v515_v48 = vld [vmem:[#allocation6 + $0xca0] sm:$0xff]  ;;  %806 = vmatpush1.msra.mxu0 %v391_v43 }
  0xa5   :  { %877 = vmatpush1.msra.mxu1 %v519_v44  ;;  %v384_v49 = vld [vmem:[#allocation6 + $0x888] sm:$0xff]  ;;  %807 = vmatprep.subr.mxu0 %v388_v45  ;;  %v383_v51 = vld [vmem:[#allocation6 + $0x880] sm:$0xff] }
  0xa6   :  { %v512_v50 = vld [vmem:[#allocation6 + $0xc88] sm:$0xff]  ;;  %878 = vmatprep.subr.mxu1 %v516_v46  ;;  %v511_v52 = vld [vmem:[#allocation6 + $0xc80] sm:$0xff]  ;;  %808 = vmatpush1.msra.mxu0 %v387_v47 }
  0xa7   :  { %879 = vmatpush1.msra.mxu1 %v515_v48  ;;  %v380_v53 = vld [vmem:[#allocation6 + $0x868] sm:$0xff]  ;;  %809 = vmatprep.subr.mxu0 %v384_v49  ;;  %v379_v55 = vld [vmem:[#allocation6 + $0x860] sm:$0xff] }
  0xa8   :  { %v508_v54 = vld [vmem:[#allocation6 + $0xc68] sm:$0xff]  ;;  %880 = vmatprep.subr.mxu1 %v512_v50  ;;  %v507_v56 = vld [vmem:[#allocation6 + $0xc60] sm:$0xff]  ;;  %810 = vmatpush1.msra.mxu0 %v383_v51 }
  0xa9   :  { %881 = vmatpush1.msra.mxu1 %v511_v52  ;;  %v376_v57 = vld [vmem:[#allocation6 + $0x848] sm:$0xff]  ;;  %811 = vmatprep.subr.mxu0 %v380_v53  ;;  %v375_v59 = vld [vmem:[#allocation6 + $0x840] sm:$0xff] }
  0xaa   :  { %v504_v58 = vld [vmem:[#allocation6 + $0xc48] sm:$0xff]  ;;  %882 = vmatprep.subr.mxu1 %v508_v54  ;;  %v503_v60 = vld [vmem:[#allocation6 + $0xc40] sm:$0xff]  ;;  %812 = vmatpush1.msra.mxu0 %v379_v55 }
  0xab   :  { %883 = vmatpush1.msra.mxu1 %v507_v56  ;;  %v372_v61 = vld [vmem:[#allocation6 + $0x828] sm:$0xff]  ;;  %813 = vmatprep.subr.mxu0 %v376_v57  ;;  %v371_v63 = vld [vmem:[#allocation6 + $0x820] sm:$0xff] }
  0xac   :  { %v500_v62 = vld [vmem:[#allocation6 + $0xc28] sm:$0xff]  ;;  %884 = vmatprep.subr.mxu1 %v504_v58  ;;  %v499_v0 = vld [vmem:[#allocation6 + $0xc20] sm:$0xff]  ;;  %814 = vmatpush1.msra.mxu0 %v375_v59 }
  0xad   :  { %885 = vmatpush1.msra.mxu1 %v503_v60  ;;  %v368_v1 = vld [vmem:[#allocation6 + $0x808] sm:$0xff]  ;;  %815 = vmatprep.subr.mxu0 %v372_v61  ;;  %v367_v3 = vld [vmem:[#allocation6 + $0x800] sm:$0xff] }
  0xae   :  { %v496_v2 = vld [vmem:[#allocation6 + $0xc08] sm:$0xff]  ;;  %886 = vmatprep.subr.mxu1 %v500_v62  ;;  %v495_v4 = vld [vmem:[#allocation6 + $0xc00] sm:$0xff]  ;;  %816 = vmatpush1.msra.mxu0 %v371_v63 }
  0xaf   :  { %887 = vmatpush1.msra.mxu1 %v499_v0  ;;  %v492_v5 = vld [vmem:[#allocation6 + $0xbe8] sm:$0xff]  ;;  %817 = vmatprep.subr.mxu0 %v368_v1  ;;  %v491_v7 = vld [vmem:[#allocation6 + $0xbe0] sm:$0xff] }
  0xb0   :  { %v620_v6 = vld [vmem:[#allocation6 + $0xfe8] sm:$0xff]  ;;  %888 = vmatprep.subr.mxu1 %v496_v2  ;;  %v619_v8 = vld [vmem:[#allocation6 + $0xfe0] sm:$0xff]  ;;  %818 = vmatpush1.msra.mxu0 %v367_v3 }
  0xb1   :  { %889 = vmatpush1.msra.mxu1 %v495_v4  ;;  %v488_v9 = vld [vmem:[#allocation6 + $0xbc8] sm:$0xff]  ;;  %819 = vmatprep.subr.mxu0 %v492_v5  ;;  %v487_v11 = vld [vmem:[#allocation6 + $0xbc0] sm:$0xff] }
  0xb2   :  { %v616_v10 = vld [vmem:[#allocation6 + $0xfc8] sm:$0xff]  ;;  %890 = vmatprep.subr.mxu1 %v620_v6  ;;  %v615_v12 = vld [vmem:[#allocation6 + $0xfc0] sm:$0xff]  ;;  %820 = vmatpush2.msra.mxu0 %v491_v7  ;;  %v110_v7 = vld [vmem:[#allocation3 + $0x38] sm:$0xff] }
  0xb3   :  { %891 = vmatpush2.msra.mxu1 %v619_v8  ;;  %v484_v13 = vld [vmem:[#allocation6 + $0xba8] sm:$0xff]  ;;  %821 = vmatprep.subr.mxu0 %v488_v9  ;;  %v483_v15 = vld [vmem:[#allocation6 + $0xba0] sm:$0xff]  ;;  %v174_v8 = vld [vmem:[#allocation6 + $0x1f8] sm:$0xff] }
  0xb4   :  { %v612_v14 = vld [vmem:[#allocation6 + $0xfa8] sm:$0xff]  ;;  %892 = vmatprep.subr.mxu1 %v616_v10  ;;  %v611_v16 = vld [vmem:[#allocation6 + $0xfa0] sm:$0xff]  ;;  %822 = vmatpush2.msra.mxu0 %v487_v11  ;;  %v302_v9 = vld [vmem:[#allocation6 + $0x5f8] sm:$0xff] }
  0xb5   :  { %893 = vmatpush2.msra.mxu1 %v615_v12  ;;  %v480_v17 = vld [vmem:[#allocation6 + $0xb88] sm:$0xff]  ;;  %823 = vmatprep.subr.mxu0 %v484_v13  ;;  %v479_v19 = vld [vmem:[#allocation6 + $0xb80] sm:$0xff]  ;;  %v109_v10 = vld [vmem:[#allocation3 + $0x30] sm:$0xff] }
  0xb6   :  { %v608_v18 = vld [vmem:[#allocation6 + $0xf88] sm:$0xff]  ;;  %894 = vmatprep.subr.mxu1 %v612_v14  ;;  %v607_v20 = vld [vmem:[#allocation6 + $0xf80] sm:$0xff]  ;;  %824 = vmatpush2.msra.mxu0 %v483_v15  ;;  %v173_v11 = vld [vmem:[#allocation6 + $0x1f0] sm:$0xff] }
  0xb7   :  { %895 = vmatpush2.msra.mxu1 %v611_v16  ;;  %v476_v21 = vld [vmem:[#allocation6 + $0xb68] sm:$0xff]  ;;  %825 = vmatprep.subr.mxu0 %v480_v17  ;;  %v475_v23 = vld [vmem:[#allocation6 + $0xb60] sm:$0xff]  ;;  %v301_v12 = vld [vmem:[#allocation6 + $0x5f0] sm:$0xff] }
  0xb8   :  { %v604_v22 = vld [vmem:[#allocation6 + $0xf68] sm:$0xff]  ;;  %896 = vmatprep.subr.mxu1 %v608_v18  ;;  %v603_v24 = vld [vmem:[#allocation6 + $0xf60] sm:$0xff]  ;;  %826 = vmatpush2.msra.mxu0 %v479_v19  ;;  %v170_v13 = vld [vmem:[#allocation6 + $0x1d8] sm:$0xff] }
  0xb9   :  { %897 = vmatpush2.msra.mxu1 %v607_v20  ;;  %v472_v25 = vld [vmem:[#allocation6 + $0xb48] sm:$0xff]  ;;  %827 = vmatprep.subr.mxu0 %v476_v21  ;;  %v471_v27 = vld [vmem:[#allocation6 + $0xb40] sm:$0xff]  ;;  %v298_v14 = vld [vmem:[#allocation6 + $0x5d8] sm:$0xff] }
  0xba   :  { %v600_v26 = vld [vmem:[#allocation6 + $0xf48] sm:$0xff]  ;;  %898 = vmatprep.subr.mxu1 %v604_v22  ;;  %v599_v28 = vld [vmem:[#allocation6 + $0xf40] sm:$0xff]  ;;  %828 = vmatpush2.msra.mxu0 %v475_v23  ;;  %v169_v15 = vld [vmem:[#allocation6 + $0x1d0] sm:$0xff] }
  0xbb   :  { %899 = vmatpush2.msra.mxu1 %v603_v24  ;;  %v468_v29 = vld [vmem:[#allocation6 + $0xb28] sm:$0xff]  ;;  %829 = vmatprep.subr.mxu0 %v472_v25  ;;  %v467_v31 = vld [vmem:[#allocation6 + $0xb20] sm:$0xff]  ;;  %v297_v16 = vld [vmem:[#allocation6 + $0x5d0] sm:$0xff] }
  0xbc   :  { %v596_v30 = vld [vmem:[#allocation6 + $0xf28] sm:$0xff]  ;;  %900 = vmatprep.subr.mxu1 %v600_v26  ;;  %v595_v32 = vld [vmem:[#allocation6 + $0xf20] sm:$0xff]  ;;  %830 = vmatpush2.msra.mxu0 %v471_v27  ;;  %v166_v17 = vld [vmem:[#allocation6 + $0x1b8] sm:$0xff] }
  0xbd   :  { %901 = vmatpush2.msra.mxu1 %v599_v28  ;;  %v464_v33 = vld [vmem:[#allocation6 + $0xb08] sm:$0xff]  ;;  %831 = vmatprep.subr.mxu0 %v468_v29  ;;  %v463_v35 = vld [vmem:[#allocation6 + $0xb00] sm:$0xff]  ;;  %v294_v18 = vld [vmem:[#allocation6 + $0x5b8] sm:$0xff] }
  0xbe   :  { %v592_v34 = vld [vmem:[#allocation6 + $0xf08] sm:$0xff]  ;;  %902 = vmatprep.subr.mxu1 %v596_v30  ;;  %v591_v36 = vld [vmem:[#allocation6 + $0xf00] sm:$0xff]  ;;  %832 = vmatpush2.msra.mxu0 %v467_v31  ;;  %v165_v19 = vld [vmem:[#allocation6 + $0x1b0] sm:$0xff] }
  0xbf   :  { %903 = vmatpush2.msra.mxu1 %v595_v32  ;;  %v460_v37 = vld [vmem:[#allocation6 + $0xae8] sm:$0xff]  ;;  %833 = vmatprep.subr.mxu0 %v464_v33  ;;  %v459_v39 = vld [vmem:[#allocation6 + $0xae0] sm:$0xff]  ;;  %v293_v20 = vld [vmem:[#allocation6 + $0x5b0] sm:$0xff] }
  0xc0   :  { %v588_v38 = vld [vmem:[#allocation6 + $0xee8] sm:$0xff]  ;;  %904 = vmatprep.subr.mxu1 %v592_v34  ;;  %v587_v40 = vld [vmem:[#allocation6 + $0xee0] sm:$0xff]  ;;  %834 = vmatpush2.msra.mxu0 %v463_v35  ;;  %v162_v21 = vld [vmem:[#allocation6 + $0x198] sm:$0xff] }
  0xc1   :  { %905 = vmatpush2.msra.mxu1 %v591_v36  ;;  %v456_v41 = vld [vmem:[#allocation6 + $0xac8] sm:$0xff]  ;;  %835 = vmatprep.subr.mxu0 %v460_v37  ;;  %v455_v43 = vld [vmem:[#allocation6 + $0xac0] sm:$0xff]  ;;  %v290_v22 = vld [vmem:[#allocation6 + $0x598] sm:$0xff] }
  0xc2   :  { %v584_v42 = vld [vmem:[#allocation6 + $0xec8] sm:$0xff]  ;;  %906 = vmatprep.subr.mxu1 %v588_v38  ;;  %v583_v44 = vld [vmem:[#allocation6 + $0xec0] sm:$0xff]  ;;  %836 = vmatpush2.msra.mxu0 %v459_v39  ;;  %v161_v23 = vld [vmem:[#allocation6 + $0x190] sm:$0xff] }
  0xc3   :  { %907 = vmatpush2.msra.mxu1 %v587_v40  ;;  %v452_v45 = vld [vmem:[#allocation6 + $0xaa8] sm:$0xff]  ;;  %837 = vmatprep.subr.mxu0 %v456_v41  ;;  %v451_v47 = vld [vmem:[#allocation6 + $0xaa0] sm:$0xff]  ;;  %v289_v24 = vld [vmem:[#allocation6 + $0x590] sm:$0xff] }
  0xc4   :  { %v580_v46 = vld [vmem:[#allocation6 + $0xea8] sm:$0xff]  ;;  %908 = vmatprep.subr.mxu1 %v584_v42  ;;  %v579_v48 = vld [vmem:[#allocation6 + $0xea0] sm:$0xff]  ;;  %838 = vmatpush2.msra.mxu0 %v455_v43  ;;  %v158_v25 = vld [vmem:[#allocation6 + $0x178] sm:$0xff] }
  0xc5   :  { %909 = vmatpush2.msra.mxu1 %v583_v44  ;;  %v448_v49 = vld [vmem:[#allocation6 + $0xa88] sm:$0xff]  ;;  %839 = vmatprep.subr.mxu0 %v452_v45  ;;  %v447_v51 = vld [vmem:[#allocation6 + $0xa80] sm:$0xff]  ;;  %v286_v26 = vld [vmem:[#allocation6 + $0x578] sm:$0xff] }
  0xc6   :  { %v576_v50 = vld [vmem:[#allocation6 + $0xe88] sm:$0xff]  ;;  %910 = vmatprep.subr.mxu1 %v580_v46  ;;  %v575_v52 = vld [vmem:[#allocation6 + $0xe80] sm:$0xff]  ;;  %840 = vmatpush2.msra.mxu0 %v451_v47  ;;  %v157_v27 = vld [vmem:[#allocation6 + $0x170] sm:$0xff] }
  0xc7   :  { %911 = vmatpush2.msra.mxu1 %v579_v48  ;;  %v444_v53 = vld [vmem:[#allocation6 + $0xa68] sm:$0xff]  ;;  %841 = vmatprep.subr.mxu0 %v448_v49  ;;  %v443_v55 = vld [vmem:[#allocation6 + $0xa60] sm:$0xff]  ;;  %v285_v28 = vld [vmem:[#allocation6 + $0x570] sm:$0xff] }
  0xc8   :  { %v572_v54 = vld [vmem:[#allocation6 + $0xe68] sm:$0xff]  ;;  %912 = vmatprep.subr.mxu1 %v576_v50  ;;  %v571_v56 = vld [vmem:[#allocation6 + $0xe60] sm:$0xff]  ;;  %842 = vmatpush2.msra.mxu0 %v447_v51  ;;  %v154_v29 = vld [vmem:[#allocation6 + $0x158] sm:$0xff] }
  0xc9   :  { %913 = vmatpush2.msra.mxu1 %v575_v52  ;;  %v440_v57 = vld [vmem:[#allocation6 + $0xa48] sm:$0xff]  ;;  %843 = vmatprep.subr.mxu0 %v444_v53  ;;  %v439_v59 = vld [vmem:[#allocation6 + $0xa40] sm:$0xff]  ;;  %v282_v30 = vld [vmem:[#allocation6 + $0x558] sm:$0xff] }
  0xca   :  { %v568_v58 = vld [vmem:[#allocation6 + $0xe48] sm:$0xff]  ;;  %914 = vmatprep.subr.mxu1 %v572_v54  ;;  %v567_v60 = vld [vmem:[#allocation6 + $0xe40] sm:$0xff]  ;;  %844 = vmatpush2.msra.mxu0 %v443_v55  ;;  %v153_v31 = vld [vmem:[#allocation6 + $0x150] sm:$0xff] }
  0xcb   :  { %915 = vmatpush2.msra.mxu1 %v571_v56  ;;  %v436_v61 = vld [vmem:[#allocation6 + $0xa28] sm:$0xff]  ;;  %845 = vmatprep.subr.mxu0 %v440_v57  ;;  %v435_v63 = vld [vmem:[#allocation6 + $0xa20] sm:$0xff]  ;;  %v281_v32 = vld [vmem:[#allocation6 + $0x550] sm:$0xff] }
  0xcc   :  { %v564_v62 = vld [vmem:[#allocation6 + $0xe28] sm:$0xff]  ;;  %916 = vmatprep.subr.mxu1 %v568_v58  ;;  %v563_v0 = vld [vmem:[#allocation6 + $0xe20] sm:$0xff]  ;;  %846 = vmatpush2.msra.mxu0 %v439_v59  ;;  %v150_v33 = vld [vmem:[#allocation6 + $0x138] sm:$0xff] }
  0xcd   :  { %917 = vmatpush2.msra.mxu1 %v567_v60  ;;  %v432_v1 = vld [vmem:[#allocation6 + $0xa08] sm:$0xff]  ;;  %847 = vmatprep.subr.mxu0 %v436_v61  ;;  %v431_v3 = vld [vmem:[#allocation6 + $0xa00] sm:$0xff]  ;;  %v278_v34 = vld [vmem:[#allocation6 + $0x538] sm:$0xff] }
  0xce   :  { %v560_v2 = vld [vmem:[#allocation6 + $0xe08] sm:$0xff]  ;;  %918 = vmatprep.subr.mxu1 %v564_v62  ;;  %848 = vmatpush2.msra.mxu0 %v435_v63  ;;  %v559_v5 = vld [vmem:[#allocation6 + $0xe00] sm:$0xff]  ;;  %v149_v35 = vld [vmem:[#allocation6 + $0x130] sm:$0xff] }
  0xcf   :  { %v108_v4 = vld [vmem:[#allocation3 + $0x28] sm:$0xff]  ;;  %919 = vmatpush2.msra.mxu1 %v563_v0  ;;  %v107_v6 = vld [vmem:[#allocation3 + $0x20] sm:$0xff]  ;;  %849 = vmatprep.subr.mxu0 %v432_v1  ;;  %v277_v36 = vld [vmem:[#allocation6 + $0x530] sm:$0xff] }
  0xd0   :  { %920 = vmatprep.subr.mxu1 %v560_v2  ;;  %850 = vmatpush2.msra.mxu0 %v431_v3  ;;  %v146_v37 = vld [vmem:[#allocation6 + $0x118] sm:$0xff]  ;;  %v145_v39 = vld [vmem:[#allocation6 + $0x110] sm:$0xff] }
  0xd1   :  { %851 = vmatprep.mubr.f32.mxu0 %v108_v4  ;;  %921 = vmatpush2.msra.mxu1 %v559_v5  ;;  %v274_v38 = vld [vmem:[#allocation6 + $0x518] sm:$0xff]  ;;  %v273_v40 = vld [vmem:[#allocation6 + $0x510] sm:$0xff] }
  0xd2   :  { %852 = vmatmul.mubr.f32.vlgmr.msra.gmra.mxu0 %v107_v6  ;;  %922 = vmatprep.mubr.f32.mxu1 %v110_v7  ;;  %v142_v41 = vld [vmem:[#allocation6 + $0xf8] sm:$0xff]  ;;  %v141_v43 = vld [vmem:[#allocation6 + $0xf0] sm:$0xff] }
  0xd3   :  { %929 = vmatprep.subr.mxu0 %v174_v8  ;;  %1000 = vmatprep.subr.mxu1 %v302_v9  ;;  %v270_v42 = vld [vmem:[#allocation6 + $0x4f8] sm:$0xff]  ;;  %v269_v44 = vld [vmem:[#allocation6 + $0x4f0] sm:$0xff] }
  0xd4   :  { %923 = vmatmul.mubr.f32.vlgmr.msra.gmra.mxu1 %v109_v10  ;;  %930 = vmatpush1.msra.mxu0 %v173_v11  ;;  %v138_v45 = vld [vmem:[#allocation6 + $0xd8] sm:$0xff]  ;;  %v137_v47 = vld [vmem:[#allocation6 + $0xd0] sm:$0xff] }
  0xd5   :  { %1001 = vmatpush1.msra.mxu1 %v301_v12  ;;  %931 = vmatprep.subr.mxu0 %v170_v13  ;;  %v266_v46 = vld [vmem:[#allocation6 + $0x4d8] sm:$0xff]  ;;  %v265_v48 = vld [vmem:[#allocation6 + $0x4d0] sm:$0xff] }
  0xd6   :  { %1002 = vmatprep.subr.mxu1 %v298_v14  ;;  %932 = vmatpush1.msra.mxu0 %v169_v15  ;;  %v134_v49 = vld [vmem:[#allocation6 + $0xb8] sm:$0xff]  ;;  %v133_v51 = vld [vmem:[#allocation6 + $0xb0] sm:$0xff] }
  0xd7   :  { %1003 = vmatpush1.msra.mxu1 %v297_v16  ;;  %933 = vmatprep.subr.mxu0 %v166_v17  ;;  %v262_v50 = vld [vmem:[#allocation6 + $0x4b8] sm:$0xff]  ;;  %v261_v52 = vld [vmem:[#allocation6 + $0x4b0] sm:$0xff] }
  0xd8   :  { %1004 = vmatprep.subr.mxu1 %v294_v18  ;;  %934 = vmatpush1.msra.mxu0 %v165_v19  ;;  %v130_v53 = vld [vmem:[#allocation6 + $0x98] sm:$0xff]  ;;  %v129_v55 = vld [vmem:[#allocation6 + $0x90] sm:$0xff] }
  0xd9   :  { %1005 = vmatpush1.msra.mxu1 %v293_v20  ;;  %935 = vmatprep.subr.mxu0 %v162_v21  ;;  %v258_v54 = vld [vmem:[#allocation6 + $0x498] sm:$0xff]  ;;  %v257_v56 = vld [vmem:[#allocation6 + $0x490] sm:$0xff] }
  0xda   :  { %1006 = vmatprep.subr.mxu1 %v290_v22  ;;  %936 = vmatpush1.msra.mxu0 %v161_v23  ;;  %v126_v57 = vld [vmem:[#allocation6 + $0x78] sm:$0xff]  ;;  %v125_v59 = vld [vmem:[#allocation6 + $0x70] sm:$0xff] }
  0xdb   :  { %1007 = vmatpush1.msra.mxu1 %v289_v24  ;;  %937 = vmatprep.subr.mxu0 %v158_v25  ;;  %v254_v58 = vld [vmem:[#allocation6 + $0x478] sm:$0xff]  ;;  %v253_v60 = vld [vmem:[#allocation6 + $0x470] sm:$0xff] }
  0xdc   :  { %1008 = vmatprep.subr.mxu1 %v286_v26  ;;  %938 = vmatpush1.msra.mxu0 %v157_v27  ;;  %v122_v61 = vld [vmem:[#allocation6 + $0x58] sm:$0xff]  ;;  %v121_v63 = vld [vmem:[#allocation6 + $0x50] sm:$0xff] }
  0xdd   :  { %1009 = vmatpush1.msra.mxu1 %v285_v28  ;;  %939 = vmatprep.subr.mxu0 %v154_v29  ;;  %v250_v62 = vld [vmem:[#allocation6 + $0x458] sm:$0xff]  ;;  %v249_v0 = vld [vmem:[#allocation6 + $0x450] sm:$0xff] }
  0xde   :  { %1010 = vmatprep.subr.mxu1 %v282_v30  ;;  %940 = vmatpush1.msra.mxu0 %v153_v31  ;;  %v118_v1 = vld [vmem:[#allocation6 + $0x38] sm:$0xff]  ;;  %v117_v3 = vld [vmem:[#allocation6 + $0x30] sm:$0xff] }
  0xdf   :  { %1011 = vmatpush1.msra.mxu1 %v281_v32  ;;  %941 = vmatprep.subr.mxu0 %v150_v33  ;;  %v246_v2 = vld [vmem:[#allocation6 + $0x438] sm:$0xff]  ;;  %v245_v4 = vld [vmem:[#allocation6 + $0x430] sm:$0xff] }
  0xe0   :  { %1012 = vmatprep.subr.mxu1 %v278_v34  ;;  %942 = vmatpush1.msra.mxu0 %v149_v35  ;;  %v114_v5 = vld [vmem:[#allocation6 + $0x18] sm:$0xff]  ;;  %v113_v7 = vld [vmem:[#allocation6 + $0x10] sm:$0xff] }
  0xe1   :  { %1013 = vmatpush1.msra.mxu1 %v277_v36  ;;  %943 = vmatprep.subr.mxu0 %v146_v37  ;;  %v242_v6 = vld [vmem:[#allocation6 + $0x418] sm:$0xff]  ;;  %v241_v8 = vld [vmem:[#allocation6 + $0x410] sm:$0xff] }
  0xe2   :  { %1014 = vmatprep.subr.mxu1 %v274_v38  ;;  %944 = vmatpush1.msra.mxu0 %v145_v39  ;;  %v238_v9 = vld [vmem:[#allocation6 + $0x3f8] sm:$0xff]  ;;  %v237_v11 = vld [vmem:[#allocation6 + $0x3f0] sm:$0xff] }
  0xe3   :  { %1015 = vmatpush1.msra.mxu1 %v273_v40  ;;  %945 = vmatprep.subr.mxu0 %v142_v41  ;;  %v366_v10 = vld [vmem:[#allocation6 + $0x7f8] sm:$0xff]  ;;  %v365_v12 = vld [vmem:[#allocation6 + $0x7f0] sm:$0xff] }
  0xe4   :  { %1016 = vmatprep.subr.mxu1 %v270_v42  ;;  %946 = vmatpush1.msra.mxu0 %v141_v43  ;;  %v234_v13 = vld [vmem:[#allocation6 + $0x3d8] sm:$0xff]  ;;  %v233_v15 = vld [vmem:[#allocation6 + $0x3d0] sm:$0xff] }
  0xe5   :  { %1017 = vmatpush1.msra.mxu1 %v269_v44  ;;  %947 = vmatprep.subr.mxu0 %v138_v45  ;;  %v362_v14 = vld [vmem:[#allocation6 + $0x7d8] sm:$0xff]  ;;  %v361_v16 = vld [vmem:[#allocation6 + $0x7d0] sm:$0xff] }
  0xe6   :  { %1018 = vmatprep.subr.mxu1 %v266_v46  ;;  %948 = vmatpush1.msra.mxu0 %v137_v47  ;;  %v230_v17 = vld [vmem:[#allocation6 + $0x3b8] sm:$0xff]  ;;  %v229_v19 = vld [vmem:[#allocation6 + $0x3b0] sm:$0xff] }
  0xe7   :  { %1019 = vmatpush1.msra.mxu1 %v265_v48  ;;  %949 = vmatprep.subr.mxu0 %v134_v49  ;;  %v358_v18 = vld [vmem:[#allocation6 + $0x7b8] sm:$0xff]  ;;  %v357_v20 = vld [vmem:[#allocation6 + $0x7b0] sm:$0xff] }
  0xe8   :  { %1020 = vmatprep.subr.mxu1 %v262_v50  ;;  %950 = vmatpush1.msra.mxu0 %v133_v51  ;;  %v226_v21 = vld [vmem:[#allocation6 + $0x398] sm:$0xff]  ;;  %v225_v23 = vld [vmem:[#allocation6 + $0x390] sm:$0xff] }
  0xe9   :  { %1021 = vmatpush1.msra.mxu1 %v261_v52  ;;  %951 = vmatprep.subr.mxu0 %v130_v53  ;;  %v354_v22 = vld [vmem:[#allocation6 + $0x798] sm:$0xff]  ;;  %v353_v24 = vld [vmem:[#allocation6 + $0x790] sm:$0xff] }
  0xea   :  { %1022 = vmatprep.subr.mxu1 %v258_v54  ;;  %952 = vmatpush1.msra.mxu0 %v129_v55  ;;  %v222_v25 = vld [vmem:[#allocation6 + $0x378] sm:$0xff]  ;;  %v221_v27 = vld [vmem:[#allocation6 + $0x370] sm:$0xff] }
  0xeb   :  { %1023 = vmatpush1.msra.mxu1 %v257_v56  ;;  %953 = vmatprep.subr.mxu0 %v126_v57  ;;  %v350_v26 = vld [vmem:[#allocation6 + $0x778] sm:$0xff]  ;;  %v349_v28 = vld [vmem:[#allocation6 + $0x770] sm:$0xff] }
  0xec   :  { %1024 = vmatprep.subr.mxu1 %v254_v58  ;;  %954 = vmatpush1.msra.mxu0 %v125_v59  ;;  %v218_v29 = vld [vmem:[#allocation6 + $0x358] sm:$0xff]  ;;  %v217_v31 = vld [vmem:[#allocation6 + $0x350] sm:$0xff] }
  0xed   :  { %1025 = vmatpush1.msra.mxu1 %v253_v60  ;;  %955 = vmatprep.subr.mxu0 %v122_v61  ;;  %v346_v30 = vld [vmem:[#allocation6 + $0x758] sm:$0xff]  ;;  %v345_v32 = vld [vmem:[#allocation6 + $0x750] sm:$0xff] }
  0xee   :  { %1026 = vmatprep.subr.mxu1 %v250_v62  ;;  %956 = vmatpush1.msra.mxu0 %v121_v63  ;;  %v214_v33 = vld [vmem:[#allocation6 + $0x338] sm:$0xff]  ;;  %v213_v35 = vld [vmem:[#allocation6 + $0x330] sm:$0xff] }
  0xef   :  { %1027 = vmatpush1.msra.mxu1 %v249_v0  ;;  %957 = vmatprep.subr.mxu0 %v118_v1  ;;  %v342_v34 = vld [vmem:[#allocation6 + $0x738] sm:$0xff]  ;;  %v341_v36 = vld [vmem:[#allocation6 + $0x730] sm:$0xff] }
  0xf0   :  { %1028 = vmatprep.subr.mxu1 %v246_v2  ;;  %958 = vmatpush1.msra.mxu0 %v117_v3  ;;  %v210_v37 = vld [vmem:[#allocation6 + $0x318] sm:$0xff]  ;;  %v209_v39 = vld [vmem:[#allocation6 + $0x310] sm:$0xff] }
  0xf1   :  { %1029 = vmatpush1.msra.mxu1 %v245_v4  ;;  %959 = vmatprep.subr.mxu0 %v114_v5  ;;  %v338_v38 = vld [vmem:[#allocation6 + $0x718] sm:$0xff]  ;;  %v337_v40 = vld [vmem:[#allocation6 + $0x710] sm:$0xff] }
  0xf2   :  { %1030 = vmatprep.subr.mxu1 %v242_v6  ;;  %960 = vmatpush1.msra.mxu0 %v113_v7  ;;  %v206_v41 = vld [vmem:[#allocation6 + $0x2f8] sm:$0xff]  ;;  %v205_v43 = vld [vmem:[#allocation6 + $0x2f0] sm:$0xff] }
  0xf3   :  { %1031 = vmatpush1.msra.mxu1 %v241_v8  ;;  %961 = vmatprep.subr.mxu0 %v238_v9  ;;  %v334_v42 = vld [vmem:[#allocation6 + $0x6f8] sm:$0xff]  ;;  %v333_v44 = vld [vmem:[#allocation6 + $0x6f0] sm:$0xff] }
  0xf4   :  { %1032 = vmatprep.subr.mxu1 %v366_v10  ;;  %962 = vmatpush2.msra.mxu0 %v237_v11  ;;  %v202_v45 = vld [vmem:[#allocation6 + $0x2d8] sm:$0xff]  ;;  %v201_v47 = vld [vmem:[#allocation6 + $0x2d0] sm:$0xff]  ;;  %v1640_v10 = vld [vmem:[#allocation3 + $0x8] sm:$0xff] }
  0xf5   :  { %1033 = vmatpush2.msra.mxu1 %v365_v12  ;;  %963 = vmatprep.subr.mxu0 %v234_v13  ;;  %v330_v46 = vld [vmem:[#allocation6 + $0x6d8] sm:$0xff]  ;;  %v329_v48 = vld [vmem:[#allocation6 + $0x6d0] sm:$0xff]  ;;  %v1641_v12 = vld [vmem:[#allocation3] sm:$0xff] }
  0xf6   :  { %1034 = vmatprep.subr.mxu1 %v362_v14  ;;  %964 = vmatpush2.msra.mxu0 %v233_v15  ;;  %v198_v49 = vld [vmem:[#allocation6 + $0x2b8] sm:$0xff]  ;;  %v197_v51 = vld [vmem:[#allocation6 + $0x2b0] sm:$0xff] }
  0xf7   :  { %1035 = vmatpush2.msra.mxu1 %v361_v16  ;;  %965 = vmatprep.subr.mxu0 %v230_v17  ;;  %v326_v50 = vld [vmem:[#allocation6 + $0x6b8] sm:$0xff]  ;;  %v325_v52 = vld [vmem:[#allocation6 + $0x6b0] sm:$0xff] }
  0xf8   :  { %1036 = vmatprep.subr.mxu1 %v358_v18  ;;  %966 = vmatpush2.msra.mxu0 %v229_v19  ;;  %v194_v53 = vld [vmem:[#allocation6 + $0x298] sm:$0xff]  ;;  %v193_v55 = vld [vmem:[#allocation6 + $0x290] sm:$0xff] }
  0xf9   :  { %1037 = vmatpush2.msra.mxu1 %v357_v20  ;;  %967 = vmatprep.subr.mxu0 %v226_v21  ;;  %v322_v54 = vld [vmem:[#allocation6 + $0x698] sm:$0xff]  ;;  %v321_v56 = vld [vmem:[#allocation6 + $0x690] sm:$0xff] }
  0xfa   :  { %1038 = vmatprep.subr.mxu1 %v354_v22  ;;  %968 = vmatpush2.msra.mxu0 %v225_v23  ;;  %v190_v57 = vld [vmem:[#allocation6 + $0x278] sm:$0xff]  ;;  %v189_v59 = vld [vmem:[#allocation6 + $0x270] sm:$0xff] }
  0xfb   :  { %1039 = vmatpush2.msra.mxu1 %v353_v24  ;;  %969 = vmatprep.subr.mxu0 %v222_v25  ;;  %v318_v58 = vld [vmem:[#allocation6 + $0x678] sm:$0xff]  ;;  %v317_v60 = vld [vmem:[#allocation6 + $0x670] sm:$0xff] }
  0xfc   :  { %1040 = vmatprep.subr.mxu1 %v350_v26  ;;  %970 = vmatpush2.msra.mxu0 %v221_v27  ;;  %v186_v61 = vld [vmem:[#allocation6 + $0x258] sm:$0xff]  ;;  %v185_v63 = vld [vmem:[#allocation6 + $0x250] sm:$0xff] }
  0xfd   :  { %1041 = vmatpush2.msra.mxu1 %v349_v28  ;;  %971 = vmatprep.subr.mxu0 %v218_v29  ;;  %v314_v62 = vld [vmem:[#allocation6 + $0x658] sm:$0xff]  ;;  %v313_v0 = vld [vmem:[#allocation6 + $0x650] sm:$0xff] }
  0xfe   :  { %1042 = vmatprep.subr.mxu1 %v346_v30  ;;  %972 = vmatpush2.msra.mxu0 %v217_v31  ;;  %v182_v1 = vld [vmem:[#allocation6 + $0x238] sm:$0xff]  ;;  %v181_v3 = vld [vmem:[#allocation6 + $0x230] sm:$0xff] }
  0xff   :  { %1043 = vmatpush2.msra.mxu1 %v345_v32  ;;  %973 = vmatprep.subr.mxu0 %v214_v33  ;;  %v310_v2 = vld [vmem:[#allocation6 + $0x638] sm:$0xff]  ;;  %v309_v4 = vld [vmem:[#allocation6 + $0x630] sm:$0xff] }
 0x100   :  { %1044 = vmatprep.subr.mxu1 %v342_v34  ;;  %974 = vmatpush2.msra.mxu0 %v213_v35  ;;  %v178_v5 = vld [vmem:[#allocation6 + $0x218] sm:$0xff]  ;;  %v177_v7 = vld [vmem:[#allocation6 + $0x210] sm:$0xff] }
 0x101   :  { %1045 = vmatpush2.msra.mxu1 %v341_v36  ;;  %975 = vmatprep.subr.mxu0 %v210_v37  ;;  %v306_v6 = vld [vmem:[#allocation6 + $0x618] sm:$0xff]  ;;  %v305_v8 = vld [vmem:[#allocation6 + $0x610] sm:$0xff] }
 0x102   :  { %1046 = vmatprep.subr.mxu1 %v338_v38  ;;  %976 = vmatpush2.msra.mxu0 %v209_v39  ;;  %v430_v9 = vld [vmem:[#allocation6 + $0x9f8] sm:$0xff]  ;;  %v429_v13 = vld [vmem:[#allocation6 + $0x9f0] sm:$0xff] }
 0x103   :  { %1047 = vmatpush2.msra.mxu1 %v337_v40  ;;  %977 = vmatprep.subr.mxu0 %v206_v41  ;;  %v558_v11 = vld [vmem:[#allocation6 + $0xdf8] sm:$0xff]  ;;  %v557_v14 = vld [vmem:[#allocation6 + $0xdf0] sm:$0xff] }
 0x104   :  { %1048 = vmatprep.subr.mxu1 %v334_v42  ;;  %978 = vmatpush2.msra.mxu0 %v205_v43  ;;  %v1642_v15 = vld [vmem:[#allocation3 + $0x18] sm:$0xff]  ;;  %v1643_v18 = vld [vmem:[#allocation3 + $0x10] sm:$0xff] }
 0x105   :  { %1049 = vmatpush2.msra.mxu1 %v333_v44  ;;  %979 = vmatprep.subr.mxu0 %v202_v45  ;;  %v426_v16 = vld [vmem:[#allocation6 + $0x9d8] sm:$0xff]  ;;  %v425_v19 = vld [vmem:[#allocation6 + $0x9d0] sm:$0xff] }
 0x106   :  { %1050 = vmatprep.subr.mxu1 %v330_v46  ;;  %980 = vmatpush2.msra.mxu0 %v201_v47  ;;  %v554_v17 = vld [vmem:[#allocation6 + $0xdd8] sm:$0xff]  ;;  %v553_v20 = vld [vmem:[#allocation6 + $0xdd0] sm:$0xff] }
 0x107   :  { %1051 = vmatpush2.msra.mxu1 %v329_v48  ;;  %981 = vmatprep.subr.mxu0 %v198_v49  ;;  %v422_v21 = vld [vmem:[#allocation6 + $0x9b8] sm:$0xff]  ;;  %v421_v23 = vld [vmem:[#allocation6 + $0x9b0] sm:$0xff] }
 0x108   :  { %1052 = vmatprep.subr.mxu1 %v326_v50  ;;  %982 = vmatpush2.msra.mxu0 %v197_v51  ;;  %v550_v22 = vld [vmem:[#allocation6 + $0xdb8] sm:$0xff]  ;;  %v549_v24 = vld [vmem:[#allocation6 + $0xdb0] sm:$0xff] }
 0x109   :  { %1053 = vmatpush2.msra.mxu1 %v325_v52  ;;  %983 = vmatprep.subr.mxu0 %v194_v53  ;;  %v418_v25 = vld [vmem:[#allocation6 + $0x998] sm:$0xff]  ;;  %v417_v27 = vld [vmem:[#allocation6 + $0x990] sm:$0xff] }
 0x10a   :  { %1054 = vmatprep.subr.mxu1 %v322_v54  ;;  %984 = vmatpush2.msra.mxu0 %v193_v55  ;;  %v546_v26 = vld [vmem:[#allocation6 + $0xd98] sm:$0xff]  ;;  %v545_v28 = vld [vmem:[#allocation6 + $0xd90] sm:$0xff] }
 0x10b   :  { %1055 = vmatpush2.msra.mxu1 %v321_v56  ;;  %985 = vmatprep.subr.mxu0 %v190_v57  ;;  %v414_v29 = vld [vmem:[#allocation6 + $0x978] sm:$0xff]  ;;  %v413_v31 = vld [vmem:[#allocation6 + $0x970] sm:$0xff] }
 0x10c   :  { %1056 = vmatprep.subr.mxu1 %v318_v58  ;;  %986 = vmatpush2.msra.mxu0 %v189_v59  ;;  %v542_v30 = vld [vmem:[#allocation6 + $0xd78] sm:$0xff]  ;;  %v541_v32 = vld [vmem:[#allocation6 + $0xd70] sm:$0xff] }
 0x10d   :  { %1057 = vmatpush2.msra.mxu1 %v317_v60  ;;  %987 = vmatprep.subr.mxu0 %v186_v61  ;;  %v410_v33 = vld [vmem:[#allocation6 + $0x958] sm:$0xff]  ;;  %v409_v35 = vld [vmem:[#allocation6 + $0x950] sm:$0xff] }
 0x10e   :  { %1058 = vmatprep.subr.mxu1 %v314_v62  ;;  %988 = vmatpush2.msra.mxu0 %v185_v63  ;;  %v538_v34 = vld [vmem:[#allocation6 + $0xd58] sm:$0xff]  ;;  %v537_v36 = vld [vmem:[#allocation6 + $0xd50] sm:$0xff] }
 0x10f   :  { %1059 = vmatpush2.msra.mxu1 %v313_v0  ;;  %989 = vmatprep.subr.mxu0 %v182_v1  ;;  %v406_v37 = vld [vmem:[#allocation6 + $0x938] sm:$0xff]  ;;  %v405_v39 = vld [vmem:[#allocation6 + $0x930] sm:$0xff] }
 0x110   :  { %1060 = vmatprep.subr.mxu1 %v310_v2  ;;  %990 = vmatpush2.msra.mxu0 %v181_v3  ;;  %v534_v38 = vld [vmem:[#allocation6 + $0xd38] sm:$0xff]  ;;  %v533_v40 = vld [vmem:[#allocation6 + $0xd30] sm:$0xff] }
 0x111   :  { %1061 = vmatpush2.msra.mxu1 %v309_v4  ;;  %991 = vmatprep.subr.mxu0 %v178_v5  ;;  %v402_v41 = vld [vmem:[#allocation6 + $0x918] sm:$0xff]  ;;  %v401_v43 = vld [vmem:[#allocation6 + $0x910] sm:$0xff] }
 0x112   :  { %1062 = vmatprep.subr.mxu1 %v306_v6  ;;  %992 = vmatpush2.msra.mxu0 %v177_v7  ;;  %v530_v42 = vld [vmem:[#allocation6 + $0xd18] sm:$0xff]  ;;  %v529_v44 = vld [vmem:[#allocation6 + $0xd10] sm:$0xff] }
 0x113   :  { %993 = vmatprep.mubr.f32.mxu0 %v1640_v10  ;;  %1063 = vmatpush2.msra.mxu1 %v305_v8  ;;  %v398_v45 = vld [vmem:[#allocation6 + $0x8f8] sm:$0xff]  ;;  %v397_v47 = vld [vmem:[#allocation6 + $0x8f0] sm:$0xff] }
 0x114   :  { %994 = vmatmul.mubr.f32.vlgmr.msra.gmra.mxu0 %v1641_v12  ;;  %1064 = vmatprep.mubr.f32.mxu1 %v1642_v15  ;;  %v526_v46 = vld [vmem:[#allocation6 + $0xcf8] sm:$0xff]  ;;  %v525_v48 = vld [vmem:[#allocation6 + $0xcf0] sm:$0xff] }
 0x115   :  { %1071 = vmatprep.subr.mxu0 %v430_v9  ;;  %1142 = vmatprep.subr.mxu1 %v558_v11  ;;  %v394_v49 = vld [vmem:[#allocation6 + $0x8d8] sm:$0xff]  ;;  %v393_v51 = vld [vmem:[#allocation6 + $0x8d0] sm:$0xff] }
 0x116   :  { %1065 = vmatmul.mubr.f32.vlgmr.msra.gmra.mxu1 %v1643_v18  ;;  %1072 = vmatpush1.msra.mxu0 %v429_v13  ;;  %v522_v50 = vld [vmem:[#allocation6 + $0xcd8] sm:$0xff]  ;;  %v521_v52 = vld [vmem:[#allocation6 + $0xcd0] sm:$0xff] }
 0x117   :  { %1143 = vmatpush1.msra.mxu1 %v557_v14  ;;  %1073 = vmatprep.subr.mxu0 %v426_v16  ;;  %v390_v53 = vld [vmem:[#allocation6 + $0x8b8] sm:$0xff]  ;;  %v389_v55 = vld [vmem:[#allocation6 + $0x8b0] sm:$0xff] }
 0x118   :  { %1144 = vmatprep.subr.mxu1 %v554_v17  ;;  %1074 = vmatpush1.msra.mxu0 %v425_v19  ;;  %v518_v54 = vld [vmem:[#allocation6 + $0xcb8] sm:$0xff]  ;;  %v517_v56 = vld [vmem:[#allocation6 + $0xcb0] sm:$0xff] }
 0x119   :  { %1145 = vmatpush1.msra.mxu1 %v553_v20  ;;  %1075 = vmatprep.subr.mxu0 %v422_v21  ;;  %v386_v57 = vld [vmem:[#allocation6 + $0x898] sm:$0xff]  ;;  %v385_v59 = vld [vmem:[#allocation6 + $0x890] sm:$0xff] }
 0x11a   :  { %1146 = vmatprep.subr.mxu1 %v550_v22  ;;  %1076 = vmatpush1.msra.mxu0 %v421_v23  ;;  %v514_v58 = vld [vmem:[#allocation6 + $0xc98] sm:$0xff]  ;;  %v513_v60 = vld [vmem:[#allocation6 + $0xc90] sm:$0xff] }
 0x11b   :  { %1147 = vmatpush1.msra.mxu1 %v549_v24  ;;  %1077 = vmatprep.subr.mxu0 %v418_v25  ;;  %v382_v61 = vld [vmem:[#allocation6 + $0x878] sm:$0xff]  ;;  %v381_v63 = vld [vmem:[#allocation6 + $0x870] sm:$0xff] }
 0x11c   :  { %1148 = vmatprep.subr.mxu1 %v546_v26  ;;  %1078 = vmatpush1.msra.mxu0 %v417_v27  ;;  %v510_v62 = vld [vmem:[#allocation6 + $0xc78] sm:$0xff]  ;;  %v509_v0 = vld [vmem:[#allocation6 + $0xc70] sm:$0xff] }
 0x11d   :  { %1149 = vmatpush1.msra.mxu1 %v545_v28  ;;  %1079 = vmatprep.subr.mxu0 %v414_v29  ;;  %v378_v1 = vld [vmem:[#allocation6 + $0x858] sm:$0xff]  ;;  %v377_v3 = vld [vmem:[#allocation6 + $0x850] sm:$0xff] }
 0x11e   :  { %1150 = vmatprep.subr.mxu1 %v542_v30  ;;  %1080 = vmatpush1.msra.mxu0 %v413_v31  ;;  %v506_v2 = vld [vmem:[#allocation6 + $0xc58] sm:$0xff]  ;;  %v505_v4 = vld [vmem:[#allocation6 + $0xc50] sm:$0xff] }
 0x11f   :  { %1151 = vmatpush1.msra.mxu1 %v541_v32  ;;  %1081 = vmatprep.subr.mxu0 %v410_v33  ;;  %v374_v5 = vld [vmem:[#allocation6 + $0x838] sm:$0xff]  ;;  %v373_v7 = vld [vmem:[#allocation6 + $0x830] sm:$0xff] }
 0x120   :  { %1152 = vmatprep.subr.mxu1 %v538_v34  ;;  %1082 = vmatpush1.msra.mxu0 %v409_v35  ;;  %v502_v6 = vld [vmem:[#allocation6 + $0xc38] sm:$0xff]  ;;  %v501_v8 = vld [vmem:[#allocation6 + $0xc30] sm:$0xff] }
 0x121   :  { %1153 = vmatpush1.msra.mxu1 %v537_v36  ;;  %1083 = vmatprep.subr.mxu0 %v406_v37  ;;  %v370_v9 = vld [vmem:[#allocation6 + $0x818] sm:$0xff]  ;;  %v369_v11 = vld [vmem:[#allocation6 + $0x810] sm:$0xff] }
 0x122   :  { %1154 = vmatprep.subr.mxu1 %v534_v38  ;;  %1084 = vmatpush1.msra.mxu0 %v405_v39  ;;  %v498_v10 = vld [vmem:[#allocation6 + $0xc18] sm:$0xff]  ;;  %v497_v12 = vld [vmem:[#allocation6 + $0xc10] sm:$0xff] }
 0x123   :  { %1155 = vmatpush1.msra.mxu1 %v533_v40  ;;  %1085 = vmatprep.subr.mxu0 %v402_v41  ;;  %v494_v13 = vld [vmem:[#allocation6 + $0xbf8] sm:$0xff]  ;;  %v493_v15 = vld [vmem:[#allocation6 + $0xbf0] sm:$0xff] }
 0x124   :  { %1156 = vmatprep.subr.mxu1 %v530_v42  ;;  %1086 = vmatpush1.msra.mxu0 %v401_v43  ;;  %v622_v14 = vld [vmem:[#allocation6 + $0xff8] sm:$0xff]  ;;  %v621_v16 = vld [vmem:[#allocation6 + $0xff0] sm:$0xff] }
 0x125   :  { %1157 = vmatpush1.msra.mxu1 %v529_v44  ;;  %1087 = vmatprep.subr.mxu0 %v398_v45  ;;  %v490_v17 = vld [vmem:[#allocation6 + $0xbd8] sm:$0xff]  ;;  %v489_v19 = vld [vmem:[#allocation6 + $0xbd0] sm:$0xff] }
 0x126   :  { %1158 = vmatprep.subr.mxu1 %v526_v46  ;;  %1088 = vmatpush1.msra.mxu0 %v397_v47  ;;  %v618_v18 = vld [vmem:[#allocation6 + $0xfd8] sm:$0xff]  ;;  %v617_v20 = vld [vmem:[#allocation6 + $0xfd0] sm:$0xff] }
 0x127   :  { %1159 = vmatpush1.msra.mxu1 %v525_v48  ;;  %1089 = vmatprep.subr.mxu0 %v394_v49  ;;  %v486_v21 = vld [vmem:[#allocation6 + $0xbb8] sm:$0xff]  ;;  %v485_v23 = vld [vmem:[#allocation6 + $0xbb0] sm:$0xff] }
 0x128   :  { %1160 = vmatprep.subr.mxu1 %v522_v50  ;;  %1090 = vmatpush1.msra.mxu0 %v393_v51  ;;  %v614_v22 = vld [vmem:[#allocation6 + $0xfb8] sm:$0xff]  ;;  %v613_v24 = vld [vmem:[#allocation6 + $0xfb0] sm:$0xff] }
 0x129   :  { %1161 = vmatpush1.msra.mxu1 %v521_v52  ;;  %1091 = vmatprep.subr.mxu0 %v390_v53  ;;  %v482_v25 = vld [vmem:[#allocation6 + $0xb98] sm:$0xff]  ;;  %v481_v27 = vld [vmem:[#allocation6 + $0xb90] sm:$0xff] }
 0x12a   :  { %1162 = vmatprep.subr.mxu1 %v518_v54  ;;  %1092 = vmatpush1.msra.mxu0 %v389_v55  ;;  %v610_v26 = vld [vmem:[#allocation6 + $0xf98] sm:$0xff]  ;;  %v609_v28 = vld [vmem:[#allocation6 + $0xf90] sm:$0xff] }
 0x12b   :  { %1163 = vmatpush1.msra.mxu1 %v517_v56  ;;  %1093 = vmatprep.subr.mxu0 %v386_v57  ;;  %v478_v29 = vld [vmem:[#allocation6 + $0xb78] sm:$0xff]  ;;  %v477_v31 = vld [vmem:[#allocation6 + $0xb70] sm:$0xff] }
 0x12c   :  { %1164 = vmatprep.subr.mxu1 %v514_v58  ;;  %1094 = vmatpush1.msra.mxu0 %v385_v59  ;;  %v606_v30 = vld [vmem:[#allocation6 + $0xf78] sm:$0xff]  ;;  %v605_v32 = vld [vmem:[#allocation6 + $0xf70] sm:$0xff] }
 0x12d   :  { %1165 = vmatpush1.msra.mxu1 %v513_v60  ;;  %1095 = vmatprep.subr.mxu0 %v382_v61  ;;  %v474_v33 = vld [vmem:[#allocation6 + $0xb58] sm:$0xff]  ;;  %v473_v35 = vld [vmem:[#allocation6 + $0xb50] sm:$0xff] }
 0x12e   :  { %1166 = vmatprep.subr.mxu1 %v510_v62  ;;  %1096 = vmatpush1.msra.mxu0 %v381_v63  ;;  %v602_v34 = vld [vmem:[#allocation6 + $0xf58] sm:$0xff]  ;;  %v601_v36 = vld [vmem:[#allocation6 + $0xf50] sm:$0xff] }
 0x12f   :  { %1167 = vmatpush1.msra.mxu1 %v509_v0  ;;  %1097 = vmatprep.subr.mxu0 %v378_v1  ;;  %v470_v37 = vld [vmem:[#allocation6 + $0xb38] sm:$0xff]  ;;  %v469_v39 = vld [vmem:[#allocation6 + $0xb30] sm:$0xff] }
 0x130   :  { %1168 = vmatprep.subr.mxu1 %v506_v2  ;;  %1098 = vmatpush1.msra.mxu0 %v377_v3  ;;  %v598_v38 = vld [vmem:[#allocation6 + $0xf38] sm:$0xff]  ;;  %v597_v40 = vld [vmem:[#allocation6 + $0xf30] sm:$0xff] }
 0x131   :  { %1169 = vmatpush1.msra.mxu1 %v505_v4  ;;  %1099 = vmatprep.subr.mxu0 %v374_v5  ;;  %v466_v41 = vld [vmem:[#allocation6 + $0xb18] sm:$0xff]  ;;  %v465_v43 = vld [vmem:[#allocation6 + $0xb10] sm:$0xff] }
 0x132   :  { %1170 = vmatprep.subr.mxu1 %v502_v6  ;;  %1100 = vmatpush1.msra.mxu0 %v373_v7  ;;  %v594_v42 = vld [vmem:[#allocation6 + $0xf18] sm:$0xff]  ;;  %v593_v44 = vld [vmem:[#allocation6 + $0xf10] sm:$0xff] }
 0x133   :  { %1171 = vmatpush1.msra.mxu1 %v501_v8  ;;  %1101 = vmatprep.subr.mxu0 %v370_v9  ;;  %v462_v45 = vld [vmem:[#allocation6 + $0xaf8] sm:$0xff]  ;;  %v461_v47 = vld [vmem:[#allocation6 + $0xaf0] sm:$0xff] }
 0x134   :  { %1172 = vmatprep.subr.mxu1 %v498_v10  ;;  %1102 = vmatpush1.msra.mxu0 %v369_v11  ;;  %v590_v46 = vld [vmem:[#allocation6 + $0xef8] sm:$0xff]  ;;  %v589_v48 = vld [vmem:[#allocation6 + $0xef0] sm:$0xff] }
 0x135   :  { %1173 = vmatpush1.msra.mxu1 %v497_v12  ;;  %1103 = vmatprep.subr.mxu0 %v494_v13  ;;  %v458_v49 = vld [vmem:[#allocation6 + $0xad8] sm:$0xff]  ;;  %v457_v51 = vld [vmem:[#allocation6 + $0xad0] sm:$0xff]  ;;  %v1644_v13 = vld [vmem:[#allocation3 + $0x28] sm:$0xff] }
 0x136   :  { %1174 = vmatprep.subr.mxu1 %v622_v14  ;;  %1104 = vmatpush2.msra.mxu0 %v493_v15  ;;  %v586_v50 = vld [vmem:[#allocation6 + $0xed8] sm:$0xff]  ;;  %v585_v52 = vld [vmem:[#allocation6 + $0xed0] sm:$0xff] }
 0x137   :  { %1175 = vmatpush2.msra.mxu1 %v621_v16  ;;  %1105 = vmatprep.subr.mxu0 %v490_v17  ;;  %v454_v53 = vld [vmem:[#allocation6 + $0xab8] sm:$0xff]  ;;  %v453_v55 = vld [vmem:[#allocation6 + $0xab0] sm:$0xff]  ;;  %v1646_v17 = vld [vmem:[#allocation3 + $0x20] sm:$0xff] }
 0x138   :  { %1176 = vmatprep.subr.mxu1 %v618_v18  ;;  %1106 = vmatpush2.msra.mxu0 %v489_v19  ;;  %v582_v54 = vld [vmem:[#allocation6 + $0xeb8] sm:$0xff]  ;;  %v581_v56 = vld [vmem:[#allocation6 + $0xeb0] sm:$0xff] }
 0x139   :  { %1177 = vmatpush2.msra.mxu1 %v617_v20  ;;  %1107 = vmatprep.subr.mxu0 %v486_v21  ;;  %v450_v57 = vld [vmem:[#allocation6 + $0xa98] sm:$0xff]  ;;  %v449_v59 = vld [vmem:[#allocation6 + $0xa90] sm:$0xff]  ;;  %v1245_v20 = vld [vmem:[#allocation9 + $0xe0] sm:$0xff] }
 0x13a   :  { %1178 = vmatprep.subr.mxu1 %v614_v22  ;;  %1108 = vmatpush2.msra.mxu0 %v485_v23  ;;  %v578_v58 = vld [vmem:[#allocation6 + $0xe98] sm:$0xff]  ;;  %v577_v60 = vld [vmem:[#allocation6 + $0xe90] sm:$0xff] }
 0x13b   :  { %1179 = vmatpush2.msra.mxu1 %v613_v24  ;;  %1109 = vmatprep.subr.mxu0 %v482_v25  ;;  %v446_v61 = vld [vmem:[#allocation6 + $0xa78] sm:$0xff]  ;;  %v445_v63 = vld [vmem:[#allocation6 + $0xa70] sm:$0xff] }
 0x13c   :  { %1180 = vmatprep.subr.mxu1 %v610_v26  ;;  %1110 = vmatpush2.msra.mxu0 %v481_v27  ;;  %v574_v62 = vld [vmem:[#allocation6 + $0xe78] sm:$0xff]  ;;  %v573_v0 = vld [vmem:[#allocation6 + $0xe70] sm:$0xff]  ;;  %v1309_v26 = vld [vmem:[#allocation9 + $0x2e0] sm:$0xff] }
 0x13d   :  { %1181 = vmatpush2.msra.mxu1 %v609_v28  ;;  %1111 = vmatprep.subr.mxu0 %v478_v29  ;;  %v442_v1 = vld [vmem:[#allocation6 + $0xa58] sm:$0xff]  ;;  %v441_v3 = vld [vmem:[#allocation6 + $0xa50] sm:$0xff]  ;;  %v1241_v29 = vld [vmem:[#allocation9 + $0xc0] sm:$0xff] }
 0x13e   :  { %1182 = vmatprep.subr.mxu1 %v606_v30  ;;  %1112 = vmatpush2.msra.mxu0 %v477_v31  ;;  %v570_v2 = vld [vmem:[#allocation6 + $0xe58] sm:$0xff]  ;;  %v569_v4 = vld [vmem:[#allocation6 + $0xe50] sm:$0xff] }
 0x13f   :  { %1183 = vmatpush2.msra.mxu1 %v605_v32  ;;  %1113 = vmatprep.subr.mxu0 %v474_v33  ;;  %v438_v5 = vld [vmem:[#allocation6 + $0xa38] sm:$0xff]  ;;  %v437_v7 = vld [vmem:[#allocation6 + $0xa30] sm:$0xff] }
 0x140   :  { %1184 = vmatprep.subr.mxu1 %v602_v34  ;;  %1114 = vmatpush2.msra.mxu0 %v473_v35  ;;  %v566_v6 = vld [vmem:[#allocation6 + $0xe38] sm:$0xff]  ;;  %v565_v8 = vld [vmem:[#allocation6 + $0xe30] sm:$0xff]  ;;  %v1305_v34 = vld [vmem:[#allocation9 + $0x2c0] sm:$0xff] }
 0x141   :  { %1185 = vmatpush2.msra.mxu1 %v601_v36  ;;  %1115 = vmatprep.subr.mxu0 %v470_v37  ;;  %v434_v9 = vld [vmem:[#allocation6 + $0xa18] sm:$0xff]  ;;  %v433_v11 = vld [vmem:[#allocation6 + $0xa10] sm:$0xff]  ;;  %v1237_v37 = vld [vmem:[#allocation9 + $0xa0] sm:$0xff] }
 0x142   :  { %1186 = vmatprep.subr.mxu1 %v598_v38  ;;  %1116 = vmatpush2.msra.mxu0 %v469_v39  ;;  %v562_v10 = vld [vmem:[#allocation6 + $0xe18] sm:$0xff]  ;;  %v561_v12 = vld [vmem:[#allocation6 + $0xe10] sm:$0xff] }
 0x143   :  { %1187 = vmatpush2.msra.mxu1 %v597_v40  ;;  %1117 = vmatprep.subr.mxu0 %v466_v41  ;;  %v1248_v14 = vld [vmem:[#allocation9 + $0xf8] sm:$0xff]  ;;  %v1247_v16 = vld [vmem:[#allocation9 + $0xf0] sm:$0xff]  ;;  %v1246_v19 = vld [vmem:[#allocation9 + $0xe8] sm:$0xff] }
 0x144   :  { %1188 = vmatprep.subr.mxu1 %v594_v42  ;;  %1118 = vmatpush2.msra.mxu0 %v465_v43  ;;  %v1645_v15 = vld [vmem:[#allocation3 + $0x38] sm:$0xff]  ;;  %v1647_v18 = vld [vmem:[#allocation3 + $0x30] sm:$0xff]  ;;  %v1301_v42 = vld [vmem:[#allocation9 + $0x2a0] sm:$0xff] }
 0x145   :  { %1189 = vmatpush2.msra.mxu1 %v593_v44  ;;  %1119 = vmatprep.subr.mxu0 %v462_v45  ;;  %v1244_v21 = vld [vmem:[#allocation9 + $0xd8] sm:$0xff]  ;;  %v1311_v23 = vld [vmem:[#allocation9 + $0x2f0] sm:$0xff]  ;;  %v1310_v24 = vld [vmem:[#allocation9 + $0x2e8] sm:$0xff] }
 0x146   :  { %1190 = vmatprep.subr.mxu1 %v590_v46  ;;  %1120 = vmatpush2.msra.mxu0 %v461_v47  ;;  %v1312_v22 = vld [vmem:[#allocation9 + $0x2f8] sm:$0xff]  ;;  %v1243_v25 = vld [vmem:[#allocation9 + $0xd0] sm:$0xff]  ;;  %v1242_v27 = vld [vmem:[#allocation9 + $0xc8] sm:$0xff] }
 0x147   :  { %1191 = vmatpush2.msra.mxu1 %v589_v48  ;;  %1121 = vmatprep.subr.mxu0 %v458_v49  ;;  %v1308_v28 = vld [vmem:[#allocation9 + $0x2d8] sm:$0xff]  ;;  %v1307_v30 = vld [vmem:[#allocation9 + $0x2d0] sm:$0xff]  ;;  %v1306_v32 = vld [vmem:[#allocation9 + $0x2c8] sm:$0xff] }
 0x148   :  { %1192 = vmatprep.subr.mxu1 %v586_v50  ;;  %1122 = vmatpush2.msra.mxu0 %v457_v51  ;;  %v1240_v31 = vld [vmem:[#allocation9 + $0xb8] sm:$0xff]  ;;  %v1239_v33 = vld [vmem:[#allocation9 + $0xb0] sm:$0xff]  ;;  %v1238_v35 = vld [vmem:[#allocation9 + $0xa8] sm:$0xff] }
 0x149   :  { %1193 = vmatpush2.msra.mxu1 %v585_v52  ;;  %1123 = vmatprep.subr.mxu0 %v454_v53  ;;  %v1304_v36 = vld [vmem:[#allocation9 + $0x2b8] sm:$0xff]  ;;  %v1303_v38 = vld [vmem:[#allocation9 + $0x2b0] sm:$0xff]  ;;  %v1302_v40 = vld [vmem:[#allocation9 + $0x2a8] sm:$0xff] }
 0x14a   :  { %1194 = vmatprep.subr.mxu1 %v582_v54  ;;  %1124 = vmatpush2.msra.mxu0 %v453_v55  ;;  %v1236_v39 = vld [vmem:[#allocation9 + $0x98] sm:$0xff]  ;;  %v1235_v41 = vld [vmem:[#allocation9 + $0x90] sm:$0xff]  ;;  %v1234_v43 = vld [vmem:[#allocation9 + $0x88] sm:$0xff] }
 0x14b   :  { %1195 = vmatpush2.msra.mxu1 %v581_v56  ;;  %1125 = vmatprep.subr.mxu0 %v450_v57  ;;  %v1300_v44 = vld [vmem:[#allocation9 + $0x298] sm:$0xff]  ;;  %v1233_v45 = vld [vmem:[#allocation9 + $0x80] sm:$0xff]  ;;  %v1299_v46 = vld [vmem:[#allocation9 + $0x290] sm:$0xff] }
 0x14c   :  { %1196 = vmatprep.subr.mxu1 %v578_v58  ;;  %1126 = vmatpush2.msra.mxu0 %v449_v59  ;;  %v1232_v47 = vld [vmem:[#allocation9 + $0x78] sm:$0xff]  ;;  %v1298_v48 = vld [vmem:[#allocation9 + $0x288] sm:$0xff]  ;;  %v1231_v49 = vld [vmem:[#allocation9 + $0x70] sm:$0xff] }
 0x14d   :  { %1197 = vmatpush2.msra.mxu1 %v577_v60  ;;  %1127 = vmatprep.subr.mxu0 %v446_v61  ;;  %v1297_v50 = vld [vmem:[#allocation9 + $0x280] sm:$0xff]  ;;  %v1230_v51 = vld [vmem:[#allocation9 + $0x68] sm:$0xff]  ;;  %v1296_v52 = vld [vmem:[#allocation9 + $0x278] sm:$0xff] }
 0x14e   :  { %1198 = vmatprep.subr.mxu1 %v574_v62  ;;  %1128 = vmatpush2.msra.mxu0 %v445_v63  ;;  %v1229_v53 = vld [vmem:[#allocation9 + $0x60] sm:$0xff]  ;;  %v1295_v54 = vld [vmem:[#allocation9 + $0x270] sm:$0xff]  ;;  %v1228_v55 = vld [vmem:[#allocation9 + $0x58] sm:$0xff] }
 0x14f   :  { %1199 = vmatpush2.msra.mxu1 %v573_v0  ;;  %1129 = vmatprep.subr.mxu0 %v442_v1  ;;  %v1294_v56 = vld [vmem:[#allocation9 + $0x268] sm:$0xff]  ;;  %v1227_v57 = vld [vmem:[#allocation9 + $0x50] sm:$0xff]  ;;  %v1293_v58 = vld [vmem:[#allocation9 + $0x260] sm:$0xff] }
 0x150   :  { %1200 = vmatprep.subr.mxu1 %v570_v2  ;;  %1130 = vmatpush2.msra.mxu0 %v441_v3  ;;  %v1226_v59 = vld [vmem:[#allocation9 + $0x48] sm:$0xff]  ;;  %v1292_v60 = vld [vmem:[#allocation9 + $0x258] sm:$0xff]  ;;  %v1225_v61 = vld [vmem:[#allocation9 + $0x40] sm:$0xff] }
 0x151   :  { %1201 = vmatpush2.msra.mxu1 %v569_v4  ;;  %1131 = vmatprep.subr.mxu0 %v438_v5  ;;  %v1291_v62 = vld [vmem:[#allocation9 + $0x250] sm:$0xff]  ;;  %v1224_v63 = vld [vmem:[#allocation9 + $0x38] sm:$0xff]  ;;  %v1290_v0 = vld [vmem:[#allocation9 + $0x248] sm:$0xff] }
 0x152   :  { %1202 = vmatprep.subr.mxu1 %v566_v6  ;;  %1132 = vmatpush2.msra.mxu0 %v437_v7  ;;  %v1223_v1 = vld [vmem:[#allocation9 + $0x30] sm:$0xff]  ;;  %v1289_v2 = vld [vmem:[#allocation9 + $0x240] sm:$0xff]  ;;  %v1222_v3 = vld [vmem:[#allocation9 + $0x28] sm:$0xff] }
 0x153   :  { %1203 = vmatpush2.msra.mxu1 %v565_v8  ;;  %1133 = vmatprep.subr.mxu0 %v434_v9  ;;  %v1288_v4 = vld [vmem:[#allocation9 + $0x238] sm:$0xff]  ;;  %v1221_v5 = vld [vmem:[#allocation9 + $0x20] sm:$0xff]  ;;  %v1287_v6 = vld [vmem:[#allocation9 + $0x230] sm:$0xff] }
 0x154   :  { %1204 = vmatprep.subr.mxu1 %v562_v10  ;;  %1134 = vmatpush2.msra.mxu0 %v433_v11  ;;  %v1220_v7 = vld [vmem:[#allocation9 + $0x18] sm:$0xff]  ;;  %v1286_v8 = vld [vmem:[#allocation9 + $0x228] sm:$0xff]  ;;  %v1219_v9 = vld [vmem:[#allocation9 + $0x10] sm:$0xff] }
 0x155   :  { %1135 = vmatprep.mubr.f32.mxu0 %v1644_v13  ;;  %1205 = vmatpush2.msra.mxu1 %v561_v12  ;;  %v1285_v10 = vld [vmem:[#allocation9 + $0x220] sm:$0xff]  ;;  %v1218_v11 = vld [vmem:[#allocation9 + $0x8] sm:$0xff]  ;;  %v1284_v12 = vld [vmem:[#allocation9 + $0x218] sm:$0xff] }
 0x156   :  { %1206 = vmatprep.mubr.f32.mxu1 %v1645_v15  ;;  %1136 = vmatmul.mubr.f32.vlgmr.msra.gmra.mxu0 %v1646_v17  ;;  %v1217_v13 = vld [vmem:[#allocation9] sm:$0xff]  ;;  %v1280_v15 = vld [vmem:[#allocation9 + $0x1f8] sm:$0xff]  ;;  %v1279_v17 = vld [vmem:[#allocation9 + $0x1f0] sm:$0xff] }
 0x157   :  { %1207 = vmatmul.mubr.f32.vlgmr.msra.gmra.mxu1 %v1647_v18  ;;  %1357 = vmatprep.subr.mxu0 %v1248_v14  ;;  %v1283_v14 = vld [vmem:[#allocation9 + $0x210] sm:$0xff]  ;;  %v1281_v18 = vld [vmem:[#allocation9 + $0x200] sm:$0xff] }
 0x158   :  { %1358 = vmatpush1.msra.mxu0 %v1247_v16  ;;  %1428 = vmatprep.subr.mxu1 %v1312_v22  ;;  %v1282_v16 = vld [vmem:[#allocation9 + $0x208] sm:$0xff]  ;;  %v1343_v22 = vld [vmem:[#allocation9 + $0x3f0] sm:$0xff] }
 0x159   :  { %1359 = vmatprep.subr.mxu0 %v1246_v19  ;;  %1429 = vmatpush1.msra.mxu1 %v1311_v23  ;;  %v1278_v19 = vld [vmem:[#allocation9 + $0x1e8] sm:$0xff]  ;;  %v1276_v23 = vld [vmem:[#allocation9 + $0x1d8] sm:$0xff] }
 0x15a   :  { %1360 = vmatpush1.msra.mxu0 %v1245_v20  ;;  %1430 = vmatprep.subr.mxu1 %v1310_v24  ;;  %v1344_v20 = vld [vmem:[#allocation9 + $0x3f8] sm:$0xff]  ;;  %v1342_v24 = vld [vmem:[#allocation9 + $0x3e8] sm:$0xff] }
 0x15b   :  { %1361 = vmatprep.subr.mxu0 %v1244_v21  ;;  %1431 = vmatpush1.msra.mxu1 %v1309_v26  ;;  %v1277_v21 = vld [vmem:[#allocation9 + $0x1e0] sm:$0xff] }
 0x15c   :  { %1362 = vmatpush1.msra.mxu0 %v1243_v25  ;;  %1432 = vmatprep.subr.mxu1 %v1308_v28  ;;  %v1275_v25 = vld [vmem:[#allocation9 + $0x1d0] sm:$0xff]  ;;  %v1341_v26 = vld [vmem:[#allocation9 + $0x3e0] sm:$0xff]  ;;  %v1340_v28 = vld [vmem:[#allocation9 + $0x3d8] sm:$0xff] }
 0x15d   :  { %1363 = vmatprep.subr.mxu0 %v1242_v27  ;;  %1433 = vmatpush1.msra.mxu1 %v1307_v30  ;;  %v1274_v27 = vld [vmem:[#allocation9 + $0x1c8] sm:$0xff]  ;;  %v1339_v30 = vld [vmem:[#allocation9 + $0x3d0] sm:$0xff] }
 0x15e   :  { %1364 = vmatpush1.msra.mxu0 %v1241_v29  ;;  %1434 = vmatprep.subr.mxu1 %v1306_v32  ;;  %v1273_v29 = vld [vmem:[#allocation9 + $0x1c0] sm:$0xff]  ;;  %v1272_v32 = vld [vmem:[#allocation9 + $0x1b8] sm:$0xff] }
 0x15f   :  { %1365 = vmatprep.subr.mxu0 %v1240_v31  ;;  %1435 = vmatpush1.msra.mxu1 %v1305_v34  ;;  %v625_v31 = vlaneseq  ;;  %v1271_v34 = vld [vmem:[#allocation9 + $0x1b0] sm:$0xff] }
 0x160   :  { %1366 = vmatpush1.msra.mxu0 %v1239_v33  ;;  %1436 = vmatprep.subr.mxu1 %v1304_v36  ;;  %v1338_v33 = vld [vmem:[#allocation9 + $0x3c8] sm:$0xff] }
 0x161   :  { %1367 = vmatprep.subr.mxu0 %v1238_v35  ;;  %1437 = vmatpush1.msra.mxu1 %v1303_v38  ;;  %v1337_v35 = vld [vmem:[#allocation9 + $0x3c0] sm:$0xff]  ;;  %v1270_v36 = vld [vmem:[#allocation9 + $0x1a8] sm:$0xff] }
 0x162   :  { %1368 = vmatpush1.msra.mxu0 %v1237_v37  ;;  %1438 = vmatprep.subr.mxu1 %v1302_v40  ;;  %v1336_v37 = vld [vmem:[#allocation9 + $0x3b8] sm:$0xff]  ;;  %v1269_v38 = vld [vmem:[#allocation9 + $0x1a0] sm:$0xff]  ;;  %v1871_v40 = vshrl.u32 %v625_v31, 7 }
 0x163   :  { %1369 = vmatprep.subr.mxu0 %v1236_v39  ;;  %1439 = vmatpush1.msra.mxu1 %v1301_v42  ;;  %v1335_v39 = vld [vmem:[#allocation9 + $0x3b0] sm:$0xff]  ;;  %v1334_v42 = vld [vmem:[#allocation9 + $0x3a8] sm:$0xff]  ;;  %v1321_v31 = vld [vmem:[#allocation9 + $0x340] sm:$0xff] }
 0x164   :  { %1370 = vmatpush1.msra.mxu0 %v1235_v41  ;;  %1440 = vmatprep.subr.mxu1 %v1300_v44  ;;  %v1268_v41 = vld [vmem:[#allocation9 + $0x198] sm:$0xff]  ;;  %v1333_v44 = vld [vmem:[#allocation9 + $0x3a0] sm:$0xff] }
 0x165   :  { %1371 = vmatprep.subr.mxu0 %v1234_v43  ;;  %1441 = vmatpush1.msra.mxu1 %v1299_v46  ;;  %v1267_v43 = vld [vmem:[#allocation9 + $0x190] sm:$0xff]  ;;  %v1332_v46 = vld [vmem:[#allocation9 + $0x398] sm:$0xff] }
 0x166   :  { %1372 = vmatpush1.msra.mxu0 %v1233_v45  ;;  %1442 = vmatprep.subr.mxu1 %v1298_v48  ;;  %v1266_v45 = vld [vmem:[#allocation9 + $0x188] sm:$0xff]  ;;  %v1331_v48 = vld [vmem:[#allocation9 + $0x390] sm:$0xff] }
 0x167   :  { %1373 = vmatprep.subr.mxu0 %v1232_v47  ;;  %1443 = vmatpush1.msra.mxu1 %v1297_v50  ;;  %v1265_v47 = vld [vmem:[#allocation9 + $0x180] sm:$0xff]  ;;  %v1264_v50 = vld [vmem:[#allocation9 + $0x178] sm:$0xff] }
 0x168   :  { %1374 = vmatpush1.msra.mxu0 %v1231_v49  ;;  %1444 = vmatprep.subr.mxu1 %v1296_v52  ;;  %v1874_v49 = vsub.s32 0, %v1871_v40  ;;  %v1876_v52 = vld [vmem:[#allocation8] sm:$0xf] }
 0x169   :  { %1375 = vmatprep.subr.mxu0 %v1230_v51  ;;  %1445 = vmatpush1.msra.mxu1 %v1295_v54  ;;  %v1330_v51 = vld [vmem:[#allocation9 + $0x388] sm:$0xff]  ;;  %v1329_v54 = vld [vmem:[#allocation9 + $0x380] sm:$0xff] }
 0x16a   :  { %1376 = vmatpush1.msra.mxu0 %v1229_v53  ;;  %1446 = vmatprep.subr.mxu1 %v1294_v56  ;;  %v1263_v53 = vld [vmem:[#allocation9 + $0x170] sm:$0xff]  ;;  %v1262_v56 = vld [vmem:[#allocation9 + $0x168] sm:$0xff] }
 0x16b   :  { %1377 = vmatprep.subr.mxu0 %v1228_v55  ;;  %1447 = vmatpush1.msra.mxu1 %v1293_v58  ;;  %v1879_v55 = vsub.s32 1, %v1871_v40  ;;  %v711_v58 = vpop.f32.mrf.mxu0 }
 0x16c   :  { %1378 = vmatpush1.msra.mxu0 %v1227_v57  ;;  %1448 = vmatprep.subr.mxu1 %v1292_v60  ;;  %v1328_v57 = vld [vmem:[#allocation9 + $0x378] sm:$0xff]  ;;  %v1327_v60 = vld [vmem:[#allocation9 + $0x370] sm:$0xff] }
 0x16d   :  { %1379 = vmatprep.subr.mxu0 %v1226_v59  ;;  %1449 = vmatpush1.msra.mxu1 %v1291_v62  ;;  %v1261_v59 = vld [vmem:[#allocation9 + $0x160] sm:$0xff]  ;;  %v1260_v62 = vld [vmem:[#allocation9 + $0x158] sm:$0xff] }
 0x16e   :  { %1380 = vmatpush1.msra.mxu0 %v1225_v61  ;;  %1450 = vmatprep.subr.mxu1 %v1290_v0  ;;  %v628_v61 = vrot.slane %v1876_v52, %v1874_v49  ;;  %v1259_v0 = vld [vmem:[#allocation9 + $0x150] sm:$0xff] }
 0x16f   :  { %1381 = vmatprep.subr.mxu0 %v1224_v63  ;;  %1451 = vmatpush1.msra.mxu1 %v1289_v2  ;;  %v1326_v63 = vld [vmem:[#allocation9 + $0x368] sm:$0xff]  ;;  %v632_v2 = vrot.slane %v1876_v52, %v1879_v55 }
 0x170   :  { %1382 = vmatpush1.msra.mxu0 %v1223_v1  ;;  %1452 = vmatprep.subr.mxu1 %v1288_v4  ;;  %v1325_v1 = vld [vmem:[#allocation9 + $0x360] sm:$0xff]  ;;  %v1324_v4 = vld [vmem:[#allocation9 + $0x358] sm:$0xff] }
 0x171   :  { %1383 = vmatprep.subr.mxu0 %v1222_v3  ;;  %1453 = vmatpush1.msra.mxu1 %v1287_v6  ;;  %v1258_v3 = vld [vmem:[#allocation9 + $0x148] sm:$0xff]  ;;  %v713_v6 = vpop.f32.mrf.mxu0 }
 0x172   :  { %1384 = vmatpush1.msra.mxu0 %v1221_v5  ;;  %1454 = vmatprep.subr.mxu1 %v1286_v8  ;;  %v782_v5 = vpop.f32.mrf.mxu1  ;;  %v1323_v8 = vld [vmem:[#allocation9 + $0x350] sm:$0xff] }
 0x173   :  { %1385 = vmatprep.subr.mxu0 %v1220_v7  ;;  %1455 = vmatpush1.msra.mxu1 %v1285_v10  ;;  %v1257_v7 = vld [vmem:[#allocation9 + $0x140] sm:$0xff]  ;;  %v1256_v10 = vld [vmem:[#allocation9 + $0x138] sm:$0xff] }
 0x174   :  { %1386 = vmatpush1.msra.mxu0 %v1219_v9  ;;  %1456 = vmatprep.subr.mxu1 %v1284_v12  ;;  %v712_v9 = vadd.f32 %v711_v58, %v628_v61  ;;  %v714_v12 = vadd.f32 %v713_v6, %v632_v2  ;;  %v1345_v6 = vld [vmem:[#allocation11] sm:$0x3] }
 0x175   :  { %1387 = vmatprep.subr.mxu0 %v1218_v11  ;;  %1457 = vmatpush1.msra.mxu1 %v1283_v14  ;;  %v1255_v11 = vld [vmem:[#allocation9 + $0x130] sm:$0xff]  ;;  %v784_v14 = vpop.f32.mrf.mxu1 }
 0x176   :  { %1388 = vmatpush1.msra.mxu0 %v1217_v13  ;;  %1458 = vmatprep.subr.mxu1 %v1282_v16  ;;  %v1254_v13 = vld [vmem:[#allocation9 + $0x128] sm:$0xff]  ;;  %v783_v16 = vadd.f32 %v782_v5, %v712_v9  ;;  %v1808_v5 = vmov 0   ;;  %v1354_v9 = vrot.slane %v1345_v6, %v1879_v55 }
 0x177   :  { %1389 = vmatprep.subr.mxu0 %v1280_v15  ;;  %1459 = vmatpush1.msra.mxu1 %v1281_v18  ;;  %v1253_v15 = vld [vmem:[#allocation9 + $0x120] sm:$0xff] }
 0x178   :  { %1390 = vmatpush2.msra.mxu0 %v1279_v17  ;;  %1460 = vmatprep.subr.mxu1 %v1344_v20  ;;  %v1252_v17 = vld [vmem:[#allocation9 + $0x118] sm:$0xff]  ;;  %v785_v20 = vadd.f32 %v784_v14, %v714_v12 }
 0x179   :  { %1391 = vmatprep.subr.mxu0 %v1278_v19  ;;  %1461 = vmatpush2.msra.mxu1 %v1343_v22  ;;  %v1251_v19 = vld [vmem:[#allocation9 + $0x110] sm:$0xff]  ;;  %v1250_v22 = vld [vmem:[#allocation9 + $0x108] sm:$0xff] }
 0x17a   :  { %1392 = vmatpush2.msra.mxu0 %v1277_v21  ;;  %1462 = vmatprep.subr.mxu1 %v1342_v24 }
 0x17b   :  { %1393 = vmatprep.subr.mxu0 %v1276_v23  ;;  %1463 = vmatpush2.msra.mxu1 %v1341_v26 }
 0x17c   :  { %1394 = vmatpush2.msra.mxu0 %v1275_v25  ;;  %1464 = vmatprep.subr.mxu1 %v1340_v28  ;;  %v1249_v25 = vld [vmem:[#allocation9 + $0x100] sm:$0xff] }
 0x17d   :  { %1395 = vmatprep.subr.mxu0 %v1274_v27  ;;  %1465 = vmatpush2.msra.mxu1 %v1339_v30 }
 0x17e   :  { %1396 = vmatpush2.msra.mxu0 %v1273_v29  ;;  %1466 = vmatprep.subr.mxu1 %v1338_v33  ;;  %v1322_v29 = vld [vmem:[#allocation9 + $0x348] sm:$0xff] }
 0x17f   :  { %1397 = vmatprep.subr.mxu0 %v1272_v32  ;;  %1467 = vmatpush2.msra.mxu1 %v1337_v35  ;;  %v1320_v32 = vld [vmem:[#allocation9 + $0x338] sm:$0xff] }
 0x180   :  { %1398 = vmatpush2.msra.mxu0 %v1271_v34  ;;  %1468 = vmatprep.subr.mxu1 %v1336_v37  ;;  %v1319_v34 = vld [vmem:[#allocation9 + $0x330] sm:$0xff]  ;;  %v1317_v37 = vld [vmem:[#allocation9 + $0x320] sm:$0xff] }
 0x181   :  { %1399 = vmatprep.subr.mxu0 %v1270_v36  ;;  %1469 = vmatpush2.msra.mxu1 %v1335_v39  ;;  %v1318_v36 = vld [vmem:[#allocation9 + $0x328] sm:$0xff]  ;;  %v1315_v39 = vld [vmem:[#allocation9 + $0x310] sm:$0xff] }
 0x182   :  { %1400 = vmatpush2.msra.mxu0 %v1269_v38  ;;  %1470 = vmatprep.subr.mxu1 %v1334_v42  ;;  %v1316_v38 = vld [vmem:[#allocation9 + $0x318] sm:$0xff]  ;;  %v1313_v42 = vld [vmem:[#allocation9 + $0x300] sm:$0xff] }
 0x183   :  { %1401 = vmatprep.subr.mxu0 %v1268_v41  ;;  %1471 = vmatpush2.msra.mxu1 %v1333_v44  ;;  %v1314_v41 = vld [vmem:[#allocation9 + $0x308] sm:$0xff]  ;;  %v639_v44 = vsub.s32 3, %v1871_v40 }
 0x184   :  { %1402 = vmatpush2.msra.mxu0 %v1267_v43  ;;  %1472 = vmatprep.subr.mxu1 %v1332_v46  ;;  %v635_v43 = vsub.s32 2, %v1871_v40 }
 0x185   :  { %1403 = vmatprep.subr.mxu0 %v1266_v45  ;;  %1473 = vmatpush2.msra.mxu1 %v1331_v48 }
 0x186   :  { %1404 = vmatpush2.msra.mxu0 %v1265_v47  ;;  %1474 = vmatprep.subr.mxu1 %v1330_v51  ;;  %v636_v46 = vrot.slane %v1876_v52, %v635_v43  ;;  %v640_v47 = vrot.slane %v1876_v52, %v639_v44  ;;  %v1501_v52 = vld [vmem:[#allocation12] sm:$0x3] }
 0x187   :  { %1405 = vmatprep.subr.mxu0 %v1264_v50  ;;  %1475 = vmatpush2.msra.mxu1 %v1329_v54 }
 0x188   :  { %1406 = vmatpush2.msra.mxu0 %v1263_v53  ;;  %1476 = vmatprep.subr.mxu1 %v1328_v57 }
 0x189   :  { %1407 = vmatprep.subr.mxu0 %v1262_v56  ;;  %1477 = vmatpush2.msra.mxu1 %v1327_v60 }
 0x18a   :  { %1408 = vmatpush2.msra.mxu0 %v1261_v59  ;;  %1478 = vmatprep.subr.mxu1 %v1326_v63 }
 0x18b   :  { %1409 = vmatprep.subr.mxu0 %v1260_v62  ;;  %1479 = vmatpush2.msra.mxu1 %v1325_v1 }
 0x18c   :  { %1410 = vmatpush2.msra.mxu0 %v1259_v0  ;;  %1480 = vmatprep.subr.mxu1 %v1324_v4  ;;  %v1502_v4 = vld [vmem:[#allocation2] sm:$0x1] }
 0x18d   :  { %1411 = vmatprep.subr.mxu0 %v1258_v3  ;;  %1481 = vmatpush2.msra.mxu1 %v1323_v8  ;;  %v1520_v3 = vrot.slane %v1501_v52, %v1879_v55  ;;  %v1350_v8 = vrot.slane %v1345_v6, %v1874_v49 }
 0x18e   :  { %1412 = vmatpush2.msra.mxu0 %v1257_v7  ;;  %1482 = vmatprep.subr.mxu1 %v1322_v29 }
 0x18f   :  { %1413 = vmatprep.subr.mxu0 %v1256_v10  ;;  %1483 = vmatpush2.msra.mxu1 %v1321_v31 }
 0x190   :  { %1414 = vmatpush2.msra.mxu0 %v1255_v11  ;;  %1484 = vmatprep.subr.mxu1 %v1320_v32 }
 0x191   :  { %1415 = vmatprep.subr.mxu0 %v1254_v13  ;;  %1485 = vmatpush2.msra.mxu1 %v1319_v34 }
 0x192   :  { %v853_v18 = vpop.f32.mrf.mxu0  ;;  %1416 = vmatpush2.msra.mxu0 %v1253_v15  ;;  %1486 = vmatprep.subr.mxu1 %v1318_v36 }
 0x193   :  { %v854_v21 = vadd.f32 %v853_v18, %v783_v16  ;;  %1417 = vmatprep.subr.mxu0 %v1252_v17  ;;  %1487 = vmatpush2.msra.mxu1 %v1317_v37 }
 0x194   :  { %v924_v23 = vpop.f32.mrf.mxu1  ;;  %v855_v24 = vpop.f32.mrf.mxu0  ;;  %1418 = vmatpush2.msra.mxu0 %v1251_v19  ;;  %1488 = vmatprep.subr.mxu1 %v1316_v38  ;;  %v1516_v19 = vrot.slane %v1501_v52, %v1874_v49 }
 0x195   :  { %v856_v26 = vadd.f32 %v855_v24, %v785_v20  ;;  %v925_v27 = vadd.f32 %v924_v23, %v854_v21  ;;  %1419 = vmatprep.subr.mxu0 %v1250_v22  ;;  %1489 = vmatpush2.msra.mxu1 %v1315_v39 }
 0x196   :  { %v926_v28 = vpop.f32.mrf.mxu1  ;;  %1420 = vmatpush2.msra.mxu0 %v1249_v25  ;;  %1490 = vmatprep.subr.mxu1 %v1314_v41 }
 0x197   :  { %v927_v30 = vadd.f32 %v926_v28, %v856_v26  ;;  %v1213_v35 = vmax.f32 %v925_v27, 0.0  ;;  %1491 = vmatpush2.msra.mxu1 %v1313_v42  ;;  %1635 = vset.pattern.permute.xlu0 %v1808_v5 }
 0x198   :  { %1505 = vperm.xlu0 %1635, %v1502_v4  }
 0x199   :  { %v1214_v33 = vmax.f32 %v927_v30, 0.0 }
 0x19b   :  { %1421 = vmatprep.mubr.f32.mxu0 %v1214_v33 }
 0x19c   :  { %1422 = vmatmul.mubr.f32.vlgmr.msra.gmra.mxu0 %v1213_v35 }
 0x19d   :  { %1587 = vmatprep.mubr.f32.mxu0 %v1520_v3 }
 0x1d4   :  { %v995_v45 = vpop.f32.mrf.mxu0 }
 0x1d5   :  { %v996_v51 = vadd.f32 %v995_v45, %v636_v46 }
 0x1d6   :  { %v1066_v48 = vpop.f32.mrf.mxu1  ;;  %v997_v50 = vpop.f32.mrf.mxu0 }
 0x1d7   :  { %v998_v53 = vadd.f32 %v997_v50, %v640_v47  ;;  %v1067_v56 = vadd.f32 %v1066_v48, %v996_v51 }
 0x1d8   :  { %v1068_v54 = vpop.f32.mrf.mxu1 }
 0x1d9   :  { %v1069_v59 = vadd.f32 %v1068_v54, %v998_v53 }
 0x213   :  { %v1506_v20 = vpop.permute.xlu0 %1505 }
 0x214   :  { %v1511_v21 = vrot.slane %v1506_v20, %v1874_v49 }
 0x216   :  { %v1137_v57 = vpop.f32.mrf.mxu0 }
 0x217   :  { %v1208_v58 = vpop.f32.mrf.mxu1  ;;  %v1138_v60 = vadd.f32 %v1137_v57, %v1067_v56 }
 0x218   :  { %v1139_v61 = vpop.f32.mrf.mxu0 }
 0x219   :  { %v1140_v62 = vadd.f32 %v1139_v61, %v1069_v59  ;;  %v1209_v63 = vadd.f32 %v1208_v58, %v1138_v60  ;;  %v1210_v0 = vpop.f32.mrf.mxu1 }
 0x21b   :  { %v1211_v40 = vadd.f32 %v1210_v0, %v1140_v62  ;;  %v1215_v2 = vmax.f32 %v1209_v63, 0.0 }
 0x21d   :  { %v1216_v1 = vmax.f32 %v1211_v40, 0.0 }
 0x21f   :  { %1492 = vmatprep.mubr.f32.mxu1 %v1216_v1 }
 0x220   :  { %1493 = vmatmul.mubr.f32.vlgmr.msra.gmra.mxu1 %v1215_v2 }
 0x25c   :  { %v1423_v7 = vpop.f32.mrf.mxu0 }
 0x25d   :  { %v1424_v11 = vadd.f32 %v1423_v7, %v1350_v8 }
 0x25e   :  { %v1425_v10 = vpop.f32.mrf.mxu0 }
 0x25f   :  { %v1426_v13 = vadd.f32 %v1425_v10, %v1354_v9 }
 0x2e0   :  { %v1494_v12 = vpop.f32.mrf.mxu1 }
 0x2e1   :  { %v1495_v14 = vadd.f32 %v1494_v12, %v1424_v11 }
 0x2e2   :  { %v1496_v15 = vpop.f32.mrf.mxu1 }
 0x2e3   :  { %v1497_v16 = vadd.f32 %v1496_v15, %v1426_v13  ;;  %v1499_v18 = vmax.f32 %v1495_v14, 0.0 }
 0x2e5   :  { %v1500_v17 = vmax.f32 %v1497_v16, 0.0 }
 0x2e7   :  { %1553 = vmatprep.subr.mxu0 %v1500_v17 }
 0x2e8   :  { %1554 = vmatpush1.xpose.msra.mxu0 %v1499_v18 }
 0x2eb   :  { %1588 = vmatmul.mubr.f32.vlgmr.msra.gmra.mxu0 %v1516_v19 }
 0x3ab   :  { %v1589_v22 = vpop.f32.mrf.mxu0 }
 0x3ac   :  { %v1590_v23 = vadd.f32 %v1589_v22, %v1511_v21 }
 0x3ad   :  { %v1591_v55 = vpop.f32.mrf.mxu0 }
 0x3ae   :  { %v1593_v24 = vand.u32 2147483647, %v1590_v23  ;;  %vm1600_vm1 = vcmp.ge.f32.partialorder %v1590_v23, 0.0 }
 0x3b0   :  { %v1594_v25 = vsub.f32 0.0, %v1593_v24 }
 0x3b2   :  { %v1595_v26 = vmul.f32 1.442695, %v1594_v25 }
 0x3b4   :  { %1636 = vpow2.f32 %v1595_v26 }
 0x3c1   :  { %v1637_v27 = vpop.eup %1636 }
 0x3c2   :  { %v1597_v28 = vadd.f32 1.0, %v1637_v27 }
 0x3c4   :  { %1638 = vrcp.f32 %v1597_v28 }
 0x3d1   :  { %v1639_v29 = vpop.eup %1638 }
 0x3d2   :  { %v1601_v30 = vmul.f32 %v1639_v29, %v1637_v27 }
 0x3d4   :  { %v1602_v31 = vsel %vm1600_vm1, %v1639_v29, %v1601_v30 }
 0x3d5   :  { %1604 = vst.msk [vmem:[#allocation14] sm:$0x1] %vm1603_vm0, %v1602_v31 }
 0x3d6   :  { %1779 = shalt.err (!%p1776_p6)
}
 0x3d7   :  { %1614 = dma.vmem_to_hbm [thread:$0]  %s1612_s5, 16, %s1904_s7, [#allocation5]  }
 0x3d8   :  { %1796 = dma.done.wait [#allocation5], 16  }
 0x3d9   :  { %1797 = vsyncadd [#allocation5], 4294967280 }
 0x3da   :  { %1618 = vsyncpa [#allocation4], 1 }
 0x3db   :  { %1619 = vsyncpa [#allocation7], 1 }
 0x3dc   :  { %1620 = vsyncpa [#allocation10], 1 }
 0x3dd   :  { %1621 = vsyncpa [#allocation13], 1 }
 0x3de   :  { %1622 = vsyncpa [#allocation5], 1 }

</bundles_post_ra>
